<compile_context>
chip_gen: v7x
topology: tpu7x:2x2x1
jax: 0.10.0
libtpu: 0.0.40
codegen_flags: <defaults>
</compile_context>

<pallas_src>
import jax
import jax.numpy as jnp
from jax.experimental import pallas as pl
from jax.experimental.pallas import tpu as pltpu

# Problem sizes (from the module definition)
C_SE = 52      # input channels of conv2d92
C_MID = 1248   # output of conv2d92 == channels of x279
C_OUT = 208    # output channels of conv2d93 / batchnorm
H = W = 7
HW = H * W
BN_EPS = 1e-5


def se_conv_bn_kernel(x_se_ref, x_main_ref, w92t_ref, b92_ref, w93t_ref,
                      gamma_ref, beta_ref, out_ref):
    # ---- conv2d92 (1x1, with bias): (1,52) @ (52,1248) -> (1,1248), f32 math ----
    w92t = w92t_ref[...].astype(jnp.float32)                         # bf16 on the wire
    se = jnp.dot(x_se_ref[...], w92t,
                 preferred_element_type=jnp.float32) + b92_ref[...]  # (1, 1248)

    # ---- sigmoid gate (single EUP transcendental, lane-dense) ----
    gate = jax.nn.sigmoid(se)                                        # (1, 1248) f32

    # ---- elementwise scale (broadcast over the 49 spatial rows), cast for MXU ----
    scaled = (gate * x_main_ref[...].astype(jnp.float32)).astype(jnp.bfloat16)  # (49,1248)

    # ---- conv2d93 (1x1, no bias): (49,1248) @ (1248,208) bf16 -> f32 acc ----
    y = jnp.dot(scaled, w93t_ref[...], preferred_element_type=jnp.float32)  # (49, 208)

    # ---- BatchNorm2d, training mode: biased batch stats over the 49 positions ----
    # TODO(synk): running_mean / running_var buffers (momentum=0.1) are not updated
    # here; only the forward normalization with batch statistics is produced.
    mean = jnp.mean(y, axis=0, keepdims=True)                        # (1, 208)
    diff = y - mean
    var = jnp.mean(diff * diff, axis=0, keepdims=True)               # biased variance
    scale = gamma_ref[...] * jax.lax.rsqrt(var + BN_EPS)             # fold gamma
    out_ref[...] = diff * scale + beta_ref[...]                      # (49, 208)


def se_conv_bn(x282, x279, w92, b92, w93, gamma, beta):
    """x282: [1,52,1,1], x279: [1,1248,7,7] -> [1,208,7,7] (float32)."""
    x_se = x282.reshape(1, C_SE).astype(jnp.float32)                        # (1, 52)
    x_main = x279.reshape(C_MID, HW).T.astype(jnp.bfloat16)                 # (49, 1248)
    w92t = w92.reshape(C_MID, C_SE).T.astype(jnp.bfloat16)                  # (52, 1248)
    b92_2d = b92.reshape(1, C_MID).astype(jnp.float32)                      # (1, 1248)
    w93t = w93.reshape(C_OUT, C_MID).T.astype(jnp.bfloat16)                 # (1248, 208)
    gamma_2d = gamma.reshape(1, C_OUT).astype(jnp.float32)                  # (1, 208)
    beta_2d = beta.reshape(1, C_OUT).astype(jnp.float32)                    # (1, 208)

    vmem_spec = pl.BlockSpec(memory_space=pltpu.MemorySpace.VMEM)

    flops = 2 * HW * C_MID * C_OUT + 2 * C_SE * C_MID
    bytes_accessed = (
        x_se.size * 4 + x_main.size * 2 + w92t.size * 2 + b92_2d.size * 4
        + w93t.size * 2 + gamma_2d.size * 4 + beta_2d.size * 4
        + HW * C_OUT * 4
    )
    cost = pl.CostEstimate(flops=flops,
                           transcendentals=C_MID + C_OUT,
                           bytes_accessed=bytes_accessed)

    out_sm = pl.pallas_call(
        se_conv_bn_kernel,
        out_shape=jax.ShapeDtypeStruct((HW, C_OUT), jnp.float32),
        in_specs=[vmem_spec] * 7,
        out_specs=vmem_spec,
        cost_estimate=cost,
    )(x_se, x_main, w92t, b92_2d, w93t, gamma_2d, beta_2d)

    # Spatial-major (49, 208) -> NCHW (1, 208, 7, 7); 41 KB transpose in the wrapper.
    return out_sm.T.reshape(1, C_OUT, H, W)


def _reference(x282, x279, w92, b92, w93, gamma, beta):
    """Pure-JAX f32 reference mirroring the PyTorch forward (BN in training mode)."""
    se = jnp.einsum('oc,c->o', w92.reshape(C_MID, C_SE), x282.reshape(C_SE)) + b92
    gate = jax.nn.sigmoid(se)[None, :, None, None]
    scaled = gate * x279
    y = jnp.einsum('oc,nchw->nohw', w93.reshape(C_OUT, C_MID), scaled)
    mean = jnp.mean(y, axis=(0, 2, 3), keepdims=True)
    var = jnp.mean((y - mean) ** 2, axis=(0, 2, 3), keepdims=True)
    norm = (y - mean) / jnp.sqrt(var + BN_EPS)
    return norm * gamma[None, :, None, None] + beta[None, :, None, None]


if __name__ == "__main__":
    key = jax.random.PRNGKey(0)
    k1, k2, k3, k4, k5, k6, k7 = jax.random.split(key, 7)

    # Inputs (shapes implied by the module's forward)
    x282 = jax.random.normal(k1, (1, C_SE, 1, 1), dtype=jnp.float32)
    x279 = jax.random.normal(k2, (1, C_MID, H, W), dtype=jnp.float32)

    # Deterministic parameter init (synthetic, not a checkpoint)
    w92 = jax.random.normal(k3, (C_MID, C_SE, 1, 1), dtype=jnp.float32) * 0.05
    b92 = jax.random.normal(k4, (C_MID,), dtype=jnp.float32) * 0.05
    w93 = jax.random.normal(k5, (C_OUT, C_MID, 1, 1), dtype=jnp.float32) * 0.02
    gamma = 1.0 + 0.1 * jax.random.normal(k6, (C_OUT,), dtype=jnp.float32)
    beta = 0.1 * jax.random.normal(k7, (C_OUT,), dtype=jnp.float32)

    out = se_conv_bn(x282, x279, w92, b92, w93, gamma, beta)
    out = jax.block_until_ready(out)

    ref = jax.block_until_ready(_reference(x282, x279, w92, b92, w93, gamma, beta))
    assert out.shape == (1, C_OUT, H, W)
    # Tolerance accounts for bf16 weight/activation transfer (f32 MXU accumulation);
    # BN-normalized outputs are O(1), observed error is well below this bound.
    assert jnp.allclose(out, ref, atol=5e-2, rtol=5e-2), "mismatch vs reference"

    print("KERNEL_OK")
</pallas_src>

<mosaic_0001>
module attributes {stable_mosaic.version = 11 : i64} {
  func.func @se_conv_bn_kernel(%arg0: memref<1x52xf32, #tpu.memory_space<vmem>>, %arg1: memref<49x1248xbf16, #tpu.memory_space<vmem>>, %arg2: memref<52x1248xbf16, #tpu.memory_space<vmem>>, %arg3: memref<1x1248xf32, #tpu.memory_space<vmem>>, %arg4: memref<1248x208xbf16, #tpu.memory_space<vmem>>, %arg5: memref<1x208xf32, #tpu.memory_space<vmem>>, %arg6: memref<1x208xf32, #tpu.memory_space<vmem>>, %arg7: memref<49x208xf32, #tpu.memory_space<vmem>>) attributes {dimension_semantics = [], scalar_prefetch = 0 : i64, scratch_operands = 0 : i64, tpu.core_type = #tpu.core_type<tc>} {
    %c0 = arith.constant 0 : index
    %c0_0 = arith.constant 0 : index
    %0 = vector.load %arg2[%c0, %c0_0] : memref<52x1248xbf16, #tpu.memory_space<vmem>>, vector<52x1248xbf16>
    %1 = arith.extf %0 : vector<52x1248xbf16> to vector<52x1248xf32>
    %c0_1 = arith.constant 0 : index
    %c0_2 = arith.constant 0 : index
    %2 = vector.load %arg0[%c0_1, %c0_2] : memref<1x52xf32, #tpu.memory_space<vmem>>, vector<1x52xf32>
    %cst = arith.constant dense<0.000000e+00> : vector<1x1248xf32>
    %3 = tpu.matmul %2, %1, %cst {dimension_numbers = #tpu.dot_dimension_numbers<[1], [0], [0], [1], [0, 0, 1, 1], [], []>} : vector<1x52xf32>, vector<52x1248xf32>, vector<1x1248xf32> -> vector<1x1248xf32>
    %c0_3 = arith.constant 0 : index
    %c0_4 = arith.constant 0 : index
    %4 = vector.load %arg3[%c0_3, %c0_4] : memref<1x1248xf32, #tpu.memory_space<vmem>>, vector<1x1248xf32>
    %5 = arith.addf %3, %4 : vector<1x1248xf32>
    %6 = arith.negf %5 : vector<1x1248xf32>
    %7 = math.exp %6 : vector<1x1248xf32>
    %cst_5 = arith.constant 1.000000e+00 : f32
    %8 = vector.broadcast %cst_5 : f32 to vector<1x1248xf32>
    %9 = arith.addf %8, %7 : vector<1x1248xf32>
    %10 = arith.divf %8, %9 : vector<1x1248xf32>
    %c0_6 = arith.constant 0 : index
    %c0_7 = arith.constant 0 : index
    %11 = vector.load %arg1[%c0_6, %c0_7] : memref<49x1248xbf16, #tpu.memory_space<vmem>>, vector<49x1248xbf16>
    %12 = arith.extf %11 : vector<49x1248xbf16> to vector<49x1248xf32>
    %13 = vector.broadcast %10 : vector<1x1248xf32> to vector<49x1248xf32>
    %14 = arith.mulf %13, %12 : vector<49x1248xf32>
    %15 = arith.truncf %14 : vector<49x1248xf32> to vector<49x1248xbf16>
    %c0_8 = arith.constant 0 : index
    %c0_9 = arith.constant 0 : index
    %16 = vector.load %arg4[%c0_8, %c0_9] : memref<1248x208xbf16, #tpu.memory_space<vmem>>, vector<1248x208xbf16>
    %cst_10 = arith.constant dense<0.000000e+00> : vector<49x208xf32>
    %17 = tpu.matmul %15, %16, %cst_10 {dimension_numbers = #tpu.dot_dimension_numbers<[1], [0], [0], [1], [0, 0, 1, 1], [], []>} : vector<49x1248xbf16>, vector<1248x208xbf16>, vector<49x208xf32> -> vector<49x208xf32>
    %cst_11 = arith.constant dense<0.000000e+00> : vector<208xf32>
    %18 = vector.multi_reduction <add>, %17, %cst_11 [0] : vector<49x208xf32> to vector<208xf32>
    %19 = vector.shape_cast %18 : vector<208xf32> to vector<1x208xf32>
    %cst_12 = arith.constant 4.900000e+01 : f32
    %20 = vector.broadcast %cst_12 : f32 to vector<1x208xf32>
    %21 = arith.divf %19, %20 : vector<1x208xf32>
    %22 = vector.broadcast %21 : vector<1x208xf32> to vector<49x208xf32>
    %23 = arith.subf %17, %22 : vector<49x208xf32>
    %24 = arith.mulf %23, %23 : vector<49x208xf32>
    %cst_13 = arith.constant dense<0.000000e+00> : vector<208xf32>
    %25 = vector.multi_reduction <add>, %24, %cst_13 [0] : vector<49x208xf32> to vector<208xf32>
    %26 = vector.shape_cast %25 : vector<208xf32> to vector<1x208xf32>
    %cst_14 = arith.constant 4.900000e+01 : f32
    %27 = vector.broadcast %cst_14 : f32 to vector<1x208xf32>
    %28 = arith.divf %26, %27 : vector<1x208xf32>
    %c0_15 = arith.constant 0 : index
    %c0_16 = arith.constant 0 : index
    %29 = vector.load %arg5[%c0_15, %c0_16] : memref<1x208xf32, #tpu.memory_space<vmem>>, vector<1x208xf32>
    %cst_17 = arith.constant 9.99999974E-6 : f32
    %30 = vector.broadcast %cst_17 : f32 to vector<1x208xf32>
    %31 = arith.addf %28, %30 : vector<1x208xf32>
    %32 = math.rsqrt %31 : vector<1x208xf32>
    %33 = arith.mulf %29, %32 : vector<1x208xf32>
    %34 = vector.broadcast %33 : vector<1x208xf32> to vector<49x208xf32>
    %35 = arith.mulf %23, %34 : vector<49x208xf32>
    %c0_18 = arith.constant 0 : index
    %c0_19 = arith.constant 0 : index
    %36 = vector.load %arg6[%c0_18, %c0_19] : memref<1x208xf32, #tpu.memory_space<vmem>>, vector<1x208xf32>
    %37 = vector.broadcast %36 : vector<1x208xf32> to vector<49x208xf32>
    %38 = arith.addf %35, %37 : vector<49x208xf32>
    %c0_20 = arith.constant 0 : index
    %c0_21 = arith.constant 0 : index
    %39 = vector.load %arg7[%c0_20, %c0_21] : memref<49x208xf32, #tpu.memory_space<vmem>>, vector<49x208xf32>
    tpu.vector_store %arg7[%c0_20, %c0_21], %38 {strides = array<i32>} : memref<49x208xf32, #tpu.memory_space<vmem>>, vector<49x208xf32>,
    return
  }
}

</mosaic_0001>

<bundles_post_ra>
// kernel: tpu_custom_call.1
= control target key start
LH: loop header
LB: loop body
LE: loop exit
PB: predicated region body
PF: predicated region fallthrough
CT: control target
= control target key end

     0   :  { %v3091_v2 = vmov 0.0   ;;  %vm192_vm0 = vcmask 1043456   ;;  %vm188_vm1 = vcmask 424960   ;;  %s4155_s0 = inlined_call_operand.vmem [shape: f32[1,52], index: 0, kind: input, shape index: {}]   ;;  %s4156_s1 = inlined_call_operand.vmem [shape: bf16[49,1248], index: 1, kind: input, shape index: {}]   ;;  %s4157_s2 = inlined_call_operand.vmem [shape: bf16[52,1248], index: 2, kind: input, shape index: {}]   ;;  %s4158_s3 = inlined_call_operand.vmem [shape: f32[1,1248], index: 3, kind: input, shape index: {}]   ;;  %s4159_s4 = inlined_call_operand.vmem [shape: bf16[1248,208], index: 4, kind: input, shape index: {}]   ;;  %s4160_s5 = inlined_call_operand.vmem [shape: f32[1,208], index: 5, kind: input, shape index: {}]   ;;  %s4161_s6 = inlined_call_operand.vmem [shape: f32[1,208], index: 6, kind: input, shape index: {}]   ;;  %s4162_s7 = inlined_call_operand.hbm [shape: f32[49,208], index: 7, kind: output, shape index: {}]  }
   0x1   :  { %v2744_v0 = vld [vmem:[%s4157_s2 + $0x4] ss:$40 sps:$4 sm:$0xff]   ;;  %v2746_v1 = vld [vmem:[%s4157_s2] ss:$40 sps:$4 sm:$0xff]   ;;  %287 = vmatprep.mubr.f32.mxu0 %v3091_v2  ;;  %500 = vmatprep.mubr.f32.mxu1 %v3091_v2  ;;  %v2747_v3 = vld [vmem:[%s4157_s2 + $0x54] ss:$40 sps:$4 sm:$0xff]  }
   0x2   :  { %2588 = vmatprep.subr.bf16.mxu0 %v2744_v0  ;;  %v2749_v4 = vld [vmem:[%s4157_s2 + $0x50] ss:$40 sps:$4 sm:$0xff]   ;;  %v2750_v5 = vld [vmem:[%s4157_s2 + $0xa4] ss:$40 sps:$4 sm:$0xff]   ;;  %v2752_v7 = vld [vmem:[%s4157_s2 + $0xa0] ss:$40 sps:$4 sm:$0xff]  }
   0x3   :  { %2590 = vmatpush1.bf16.msra.mxu0 %v2746_v1  ;;  %v58_v6 = vld [vmem:[%s4157_s2 + $0xf0] sm:$0x33]  ;;  %v3163_v10 = vld [vmem:[%s4155_s0] sm:$0x1]  ;;  %v2756_v13 = vld [vmem:[%s4157_s2 + $0x5c] ss:$40 sps:$4 sm:$0xff]  }
   0x4   :  { %2592 = vmatprep.subr.bf16.mxu0 %v2747_v3  ;;  %v124_v8 = vunpack.c.h.bf16 %v58_v6  ;;  %v123_v9 = vunpack.c.l.bf16 %v58_v6  ;;  %v2753_v11 = vld [vmem:[%s4157_s2 + $0xc] ss:$40 sps:$4 sm:$0xff]   ;;  %v2755_v12 = vld [vmem:[%s4157_s2 + $0x8] ss:$40 sps:$4 sm:$0xff]   ;;  %v2771_v14 = vld [vmem:[%s4157_s2 + $0x1c] ss:$40 sps:$4 sm:$0xff]  }
   0x5   :  { %v2773_v15 = vld [vmem:[%s4157_s2 + $0x18] ss:$40 sps:$4 sm:$0xff]   ;;  %v2774_v16 = vld [vmem:[%s4157_s2 + $0x6c] ss:$40 sps:$4 sm:$0xff]   ;;  %2624 = vmatprep.subr.bf16.mxu1 %v2771_v14  ;;  %v2776_v20 = vld [vmem:[%s4157_s2 + $0x68] ss:$40 sps:$4 sm:$0xff]  }
   0x6   :  { %v2758_v17 = vld [vmem:[%s4157_s2 + $0x58] ss:$40 sps:$4 sm:$0xff]   ;;  %v2759_v18 = vld [vmem:[%s4157_s2 + $0xac] ss:$40 sps:$4 sm:$0xff]   ;;  %2626 = vmatpush1.bf16.msra.mxu1 %v2773_v15  ;;  %v2777_v21 = vld [vmem:[%s4157_s2 + $0xbc] ss:$40 sps:$4 sm:$0xff]  }
   0x7   :  { %2594 = vmatpush1.bf16.msra.mxu0 %v2749_v4  ;;  %v59_v19 = vld [vmem:[%s4157_s2 + $0xf8] sm:$0x33]  ;;  %2628 = vmatprep.subr.bf16.mxu1 %v2774_v16  ;;  %v2761_v22 = vld [vmem:[%s4157_s2 + $0xa8] ss:$40 sps:$4 sm:$0xff]   ;;  %v2765_v30 = vld [vmem:[%s4157_s2 + $0x64] ss:$40 sps:$4 sm:$0xff]  }
   0x8   :  { %2596 = vmatprep.subr.bf16.mxu0 %v2750_v5  ;;  %v61_v23 = vld [vmem:[%s4157_s2 + $0x108] sm:$0x33]  ;;  %v126_v24 = vunpack.c.h.bf16 %v59_v19  ;;  %v2779_v25 = vld [vmem:[%s4157_s2 + $0xb8] ss:$40 sps:$4 sm:$0xff]   ;;  %v125_v27 = vunpack.c.l.bf16 %v59_v19  ;;  %v2762_v28 = vld [vmem:[%s4157_s2 + $0x14] ss:$40 sps:$4 sm:$0xff]  }
   0x9   :  { %v130_v26 = vunpack.c.h.bf16 %v61_v23  ;;  %v2764_v29 = vld [vmem:[%s4157_s2 + $0x10] ss:$40 sps:$4 sm:$0xff]   ;;  %v129_v31 = vunpack.c.l.bf16 %v61_v23  ;;  %v2767_v32 = vld [vmem:[%s4157_s2 + $0x60] ss:$40 sps:$4 sm:$0xff]   ;;  %v2768_v33 = vld [vmem:[%s4157_s2 + $0xb4] ss:$40 sps:$4 sm:$0xff]  }
   0xa   :  { %2630 = vmatpush1.bf16.msra.mxu1 %v2776_v20  ;;  %v60_v34 = vld [vmem:[%s4157_s2 + $0x100] sm:$0x33]  ;;  %v2770_v35 = vld [vmem:[%s4157_s2 + $0xb0] ss:$40 sps:$4 sm:$0xff]   ;;  %v2783_v40 = vld [vmem:[%s4157_s2 + $0x74] ss:$40 sps:$4 sm:$0xff]  }
   0xb   :  { %2598 = vmatpush1.bf16.msra.mxu0 %v2752_v7  ;;  %2632 = vmatprep.subr.bf16.mxu1 %v2777_v21  ;;  %v128_v36 = vunpack.c.h.bf16 %v60_v34  ;;  %v2780_v37 = vld [vmem:[%s4157_s2 + $0x24] ss:$40 sps:$4 sm:$0xff]   ;;  %v127_v38 = vunpack.c.l.bf16 %v60_v34  ;;  %v2782_v39 = vld [vmem:[%s4157_s2 + $0x20] ss:$40 sps:$4 sm:$0xff]   ;;  %v2785_v41 = vld [vmem:[%s4157_s2 + $0x70] ss:$40 sps:$4 sm:$0xff]  }
   0xc   :  { %2402 = vmatprep.subr.msk.mxu0 %vm192_vm0, %v124_v8  ;;  %v2786_v42 = vld [vmem:[%s4157_s2 + $0xc4] ss:$40 sps:$4 sm:$0xff]   ;;  %v62_v43 = vld [vmem:[%s4157_s2 + $0x110] sm:$0x33]  ;;  %v2788_v44 = vld [vmem:[%s4157_s2 + $0xc0] ss:$40 sps:$4 sm:$0xff]  }
   0xd   :  { %v132_v45 = vunpack.c.h.bf16 %v62_v43  ;;  %v2791_v46 = vld [vmem:[%s4159_s4 + $0x4] ss:$8 sps:$4 sm:$0xff]   ;;  %v131_v47 = vunpack.c.l.bf16 %v62_v43  ;;  %v2789_v48 = vld [vmem:[%s4159_s4] ss:$8 sps:$4 sm:$0xff]   ;;  %v2794_v49 = vld [vmem:[%s4159_s4 + $0x14] ss:$8 sps:$4 sm:$0xff]  }
   0xe   :  { %2634 = vmatpush1.bf16.msra.mxu1 %v2779_v25  ;;  %v2792_v50 = vld [vmem:[%s4159_s4 + $0x10] ss:$8 sps:$4 sm:$0xff]   ;;  %v2797_v51 = vld [vmem:[%s4159_s4 + $0x24] ss:$8 sps:$4 sm:$0xff]   ;;  %v2795_v52 = vld [vmem:[%s4159_s4 + $0x20] ss:$8 sps:$4 sm:$0xff]  }
   0xf   :  { %2403 = vmatpush1.msk.msra.mxu0 %vm192_vm0, %v123_v9  ;;  %2411 = vmatprep.subr.msk.mxu1 %vm192_vm0, %v130_v26  ;;  %v2800_v53 = vld [vmem:[%s4159_s4 + $0x34] ss:$8 sps:$4 sm:$0xff]   ;;  %v2798_v54 = vld [vmem:[%s4159_s4 + $0x30] ss:$8 sps:$4 sm:$0xff]   ;;  %v2803_v55 = vld [vmem:[%s4159_s4 + $0x44] ss:$8 sps:$4 sm:$0xff]  }
  0x10   :  { %2404 = vmatmul.mubr.msk.f32.vlgmr.msra.gmra.mrb[0].mxu0 %vm188_vm1, %v3163_v10  ;;  %2600 = vmatprep.subr.bf16.mxu0 %v2753_v11  ;;  %v2801_v56 = vld [vmem:[%s4159_s4 + $0x40] ss:$8 sps:$4 sm:$0xff]   ;;  %v2806_v57 = vld [vmem:[%s4159_s4 + $0x54] ss:$8 sps:$4 sm:$0xff]   ;;  %v2804_v58 = vld [vmem:[%s4159_s4 + $0x50] ss:$8 sps:$4 sm:$0xff]  }
  0x11   :  { %2602 = vmatpush1.bf16.msra.mxu0 %v2755_v12  ;;  %358 = vmatprep.mubr.f32.mxu0 %v3091_v2  ;;  %v2809_v59 = vld [vmem:[%s4159_s4 + $0x64] ss:$8 sps:$4 sm:$0xff]   ;;  %v2807_v60 = vld [vmem:[%s4159_s4 + $0x60] ss:$8 sps:$4 sm:$0xff]  }
  0x12   :  { %2604 = vmatprep.subr.bf16.mxu0 %v2756_v13  ;;  %2412 = vmatpush1.msk.msra.mxu1 %vm192_vm0, %v129_v31 }
  0x13   :  { %2413 = vmatmul.mubr.msk.f32.vlgmr.msra.gmra.mrb[0].mxu1 %vm188_vm1, %v3163_v10 }
  0x15   :  { %2606 = vmatpush1.bf16.msra.mxu0 %v2758_v17 }
  0x16   :  { %2608 = vmatprep.subr.bf16.mxu0 %v2759_v18 }
  0x19   :  { %2610 = vmatpush1.bf16.msra.mxu0 %v2761_v22 }
  0x1a   :  { %2405 = vmatprep.subr.msk.mxu0 %vm192_vm0, %v126_v24 }
  0x1d   :  { %2406 = vmatpush1.msk.msra.mxu0 %vm192_vm0, %v125_v27 }
  0x1e   :  { %2407 = vmatmul.mubr.msk.f32.vlgmr.msra.gmra.mrb[2].mxu0 %vm188_vm1, %v3163_v10  ;;  %2612 = vmatprep.subr.bf16.mxu0 %v2762_v28 }
  0x1f   :  { %2614 = vmatpush1.bf16.msra.mxu0 %v2764_v29  ;;  %429 = vmatprep.mubr.f32.mxu0 %v3091_v2 }
  0x20   :  { %2616 = vmatprep.subr.bf16.mxu0 %v2765_v30 }
  0x23   :  { %2618 = vmatpush1.bf16.msra.mxu0 %v2767_v32 }
  0x24   :  { %2620 = vmatprep.subr.bf16.mxu0 %v2768_v33 }
  0x27   :  { %2622 = vmatpush1.bf16.msra.mxu0 %v2770_v35 }
  0x28   :  { %2408 = vmatprep.subr.msk.mxu0 %vm192_vm0, %v128_v36 }
  0x2b   :  { %2409 = vmatpush1.msk.msra.mxu0 %vm192_vm0, %v127_v38 }
  0x2c   :  { %2410 = vmatmul.mubr.msk.f32.vlgmr.msra.gmra.mrb[4].mxu0 %vm188_vm1, %v3163_v10  ;;  %2636 = vmatprep.subr.bf16.mxu0 %v2780_v37 }
  0x2d   :  { %2638 = vmatpush1.bf16.msra.mxu0 %v2782_v39  ;;  %571 = vmatprep.mubr.f32.mxu0 %v3091_v2 }
  0x2e   :  { %2640 = vmatprep.subr.bf16.mxu0 %v2783_v40 }
  0x31   :  { %2642 = vmatpush1.bf16.msra.mxu0 %v2785_v41 }
  0x32   :  { %2644 = vmatprep.subr.bf16.mxu0 %v2786_v42 }
  0x35   :  { %2646 = vmatpush1.bf16.msra.mxu0 %v2788_v44 }
  0x36   :  { %2414 = vmatprep.subr.msk.mxu0 %vm192_vm0, %v132_v45 }
  0x39   :  { %2415 = vmatpush1.msk.msra.mxu0 %vm192_vm0, %v131_v47 }
  0x3a   :  { %2416 = vmatmul.mubr.msk.f32.vlgmr.msra.gmra.mrb[6].mxu0 %vm188_vm1, %v3163_v10  ;;  %1842 = vmatprep.subr.bf16.mxu0 %v2791_v46 }
  0x3b   :  { %1843 = vmatpush1.bf16.msra.mxu0 %v2789_v48 }
  0x3c   :  { %1844 = vmatprep.subr.bf16.mxu0 %v2794_v49 }
  0x3f   :  { %1845 = vmatpush1.bf16.msra.mxu0 %v2792_v50 }
  0x40   :  { %1846 = vmatprep.subr.bf16.mxu0 %v2797_v51 }
  0x43   :  { %1847 = vmatpush1.bf16.msra.mxu0 %v2795_v52 }
  0x44   :  { %1848 = vmatprep.subr.bf16.mxu0 %v2800_v53 }
  0x47   :  { %1849 = vmatpush1.bf16.msra.mxu0 %v2798_v54 }
  0x48   :  { %1850 = vmatprep.subr.bf16.mxu0 %v2803_v55 }
  0x4b   :  { %1851 = vmatpush1.bf16.msra.mxu0 %v2801_v56 }
  0x4c   :  { %1852 = vmatprep.subr.bf16.mxu0 %v2806_v57 }
  0x4f   :  { %1853 = vmatpush1.bf16.msra.mxu0 %v2804_v58 }
  0x50   :  { %12 = vsyncpa [#allocation3], 0  ;;  %1854 = vmatprep.subr.bf16.mxu0 %v2809_v59  ;;  %v2812_v61 = vld [vmem:[%s4159_s4 + $0x74] ss:$8 sps:$4 sm:$0xff]   ;;  %v2815_v62 = vld [vmem:[%s4159_s4 + $0x204] ss:$8 sps:$4 sm:$0xff]   ;;  %v138_v49 = vlaneseq }
  0x51   :  { %v2810_v63 = vld [vmem:[%s4159_s4 + $0x70] ss:$8 sps:$4 sm:$0xff]   ;;  %v2813_v0 = vld [vmem:[%s4159_s4 + $0x200] ss:$8 sps:$4 sm:$0xff]   ;;  %1984 = vmatprep.subr.bf16.mxu1 %v2815_v62  ;;  %v2818_v1 = vld [vmem:[%s4159_s4 + $0x84] ss:$8 sps:$4 sm:$0xff]  }
  0x52   :  { %1985 = vmatpush1.bf16.msra.mxu1 %v2813_v0  ;;  %v2821_v2 = vld [vmem:[%s4159_s4 + $0x214] ss:$8 sps:$4 sm:$0xff]   ;;  %v2816_v3 = vld [vmem:[%s4159_s4 + $0x80] ss:$8 sps:$4 sm:$0xff]   ;;  %v2819_v4 = vld [vmem:[%s4159_s4 + $0x210] ss:$8 sps:$4 sm:$0xff]  }
  0x53   :  { %1855 = vmatpush1.bf16.msra.mxu0 %v2807_v60  ;;  %1986 = vmatprep.subr.bf16.mxu1 %v2821_v2  ;;  %v2824_v5 = vld [vmem:[%s4159_s4 + $0x94] ss:$8 sps:$4 sm:$0xff]   ;;  %v2827_v6 = vld [vmem:[%s4159_s4 + $0x224] ss:$8 sps:$4 sm:$0xff]   ;;  %v2822_v7 = vld [vmem:[%s4159_s4 + $0x90] ss:$8 sps:$4 sm:$0xff]  }
  0x54   :  { %1856 = vmatprep.subr.bf16.mxu0 %v2812_v61  ;;  %v2825_v8 = vld [vmem:[%s4159_s4 + $0x220] ss:$8 sps:$4 sm:$0xff]   ;;  %v2830_v9 = vld [vmem:[%s4159_s4 + $0xa4] ss:$8 sps:$4 sm:$0xff]   ;;  %v2833_v10 = vld [vmem:[%s4159_s4 + $0x234] ss:$8 sps:$4 sm:$0xff]  }
  0x55   :  { %v2828_v11 = vld [vmem:[%s4159_s4 + $0xa0] ss:$8 sps:$4 sm:$0xff]   ;;  %v2831_v12 = vld [vmem:[%s4159_s4 + $0x230] ss:$8 sps:$4 sm:$0xff]   ;;  %v2836_v13 = vld [vmem:[%s4159_s4 + $0xb4] ss:$8 sps:$4 sm:$0xff]  }
  0x56   :  { %1987 = vmatpush1.bf16.msra.mxu1 %v2819_v4  ;;  %v2839_v14 = vld [vmem:[%s4159_s4 + $0x244] ss:$8 sps:$4 sm:$0xff]   ;;  %v2834_v15 = vld [vmem:[%s4159_s4 + $0xb0] ss:$8 sps:$4 sm:$0xff]   ;;  %v2837_v16 = vld [vmem:[%s4159_s4 + $0x240] ss:$8 sps:$4 sm:$0xff]  }
  0x57   :  { %1857 = vmatpush1.bf16.msra.mxu0 %v2810_v63  ;;  %1988 = vmatprep.subr.bf16.mxu1 %v2827_v6  ;;  %v2842_v17 = vld [vmem:[%s4159_s4 + $0xc4] ss:$8 sps:$4 sm:$0xff]   ;;  %v2845_v18 = vld [vmem:[%s4159_s4 + $0x254] ss:$8 sps:$4 sm:$0xff]   ;;  %v2840_v19 = vld [vmem:[%s4159_s4 + $0xc0] ss:$8 sps:$4 sm:$0xff]  }
  0x58   :  { %1858 = vmatprep.subr.bf16.mxu0 %v2818_v1  ;;  %v2843_v20 = vld [vmem:[%s4159_s4 + $0x250] ss:$8 sps:$4 sm:$0xff]   ;;  %v2848_v21 = vld [vmem:[%s4159_s4 + $0xd4] ss:$8 sps:$4 sm:$0xff]   ;;  %v2851_v22 = vld [vmem:[%s4159_s4 + $0x264] ss:$8 sps:$4 sm:$0xff]  }
  0x59   :  { %v2846_v23 = vld [vmem:[%s4159_s4 + $0xd0] ss:$8 sps:$4 sm:$0xff]   ;;  %v2849_v24 = vld [vmem:[%s4159_s4 + $0x260] ss:$8 sps:$4 sm:$0xff]   ;;  %v2854_v25 = vld [vmem:[%s4159_s4 + $0xe4] ss:$8 sps:$4 sm:$0xff]  }
  0x5a   :  { %1989 = vmatpush1.bf16.msra.mxu1 %v2825_v8  ;;  %v2857_v26 = vld [vmem:[%s4159_s4 + $0x274] ss:$8 sps:$4 sm:$0xff]   ;;  %v2852_v27 = vld [vmem:[%s4159_s4 + $0xe0] ss:$8 sps:$4 sm:$0xff]   ;;  %v2855_v28 = vld [vmem:[%s4159_s4 + $0x270] ss:$8 sps:$4 sm:$0xff]  }
  0x5b   :  { %1859 = vmatpush1.bf16.msra.mxu0 %v2816_v3  ;;  %1990 = vmatprep.subr.bf16.mxu1 %v2833_v10  ;;  %v2860_v29 = vld [vmem:[%s4159_s4 + $0xf4] ss:$8 sps:$4 sm:$0xff]   ;;  %v2863_v30 = vld [vmem:[%s4159_s4 + $0x284] ss:$8 sps:$4 sm:$0xff]   ;;  %v2858_v31 = vld [vmem:[%s4159_s4 + $0xf0] ss:$8 sps:$4 sm:$0xff]  }
  0x5c   :  { %1860 = vmatprep.subr.bf16.mxu0 %v2824_v5  ;;  %v2861_v32 = vld [vmem:[%s4159_s4 + $0x280] ss:$8 sps:$4 sm:$0xff]   ;;  %v2866_v33 = vld [vmem:[%s4159_s4 + $0x104] ss:$8 sps:$4 sm:$0xff]   ;;  %v2869_v34 = vld [vmem:[%s4159_s4 + $0x294] ss:$8 sps:$4 sm:$0xff]  }
  0x5d   :  { %v2867_v35 = vld [vmem:[%s4159_s4 + $0x290] ss:$8 sps:$4 sm:$0xff]   ;;  %v2875_v36 = vld [vmem:[%s4159_s4 + $0x2a4] ss:$8 sps:$4 sm:$0xff]   ;;  %v2873_v37 = vld [vmem:[%s4159_s4 + $0x2a0] ss:$8 sps:$4 sm:$0xff]  }
  0x5e   :  { %1991 = vmatpush1.bf16.msra.mxu1 %v2831_v12  ;;  %v2881_v38 = vld [vmem:[%s4159_s4 + $0x2b4] ss:$8 sps:$4 sm:$0xff]   ;;  %v2879_v39 = vld [vmem:[%s4159_s4 + $0x2b0] ss:$8 sps:$4 sm:$0xff]   ;;  %v2887_v40 = vld [vmem:[%s4159_s4 + $0x2c4] ss:$8 sps:$4 sm:$0xff]  }
  0x5f   :  { %1861 = vmatpush1.bf16.msra.mxu0 %v2822_v7  ;;  %1992 = vmatprep.subr.bf16.mxu1 %v2839_v14  ;;  %v2885_v41 = vld [vmem:[%s4159_s4 + $0x2c0] ss:$8 sps:$4 sm:$0xff]   ;;  %v2893_v42 = vld [vmem:[%s4159_s4 + $0x2d4] ss:$8 sps:$4 sm:$0xff]   ;;  %v2891_v43 = vld [vmem:[%s4159_s4 + $0x2d0] ss:$8 sps:$4 sm:$0xff]  }
  0x60   :  { %1862 = vmatprep.subr.bf16.mxu0 %v2830_v9  ;;  %v2899_v44 = vld [vmem:[%s4159_s4 + $0x2e4] ss:$8 sps:$4 sm:$0xff]   ;;  %v2897_v45 = vld [vmem:[%s4159_s4 + $0x2e0] ss:$8 sps:$4 sm:$0xff]   ;;  %v2905_v46 = vld [vmem:[%s4159_s4 + $0x2f4] ss:$8 sps:$4 sm:$0xff]  }
  0x61   :  { %v2903_v47 = vld [vmem:[%s4159_s4 + $0x2f0] ss:$8 sps:$4 sm:$0xff]   ;;  %v2911_v48 = vld [vmem:[%s4159_s4 + $0x304] ss:$8 sps:$4 sm:$0xff]   ;;  %v3469_v50 = vshrl.u32 %v138_v49, 7  ;;  %vm1829_vm2 = vcmask 785408  }
  0x62   :  { %1993 = vmatpush1.bf16.msra.mxu1 %v2837_v16  ;;  %v3477_v52 = vld [vmem:[%s4158_s3] sm:$0xff]  ;;  %v648_v16 = vld [vmem:[%s4156_s1 + $0x50] sm:$0xff]  ;;  %vm2211_vm3 = vcmask 654336   ;;  %vm2202_vm4 = vcmask 1040384   ;;  %vm2223_vm5 = vcmask 647168  }
  0x63   :  { %1863 = vmatpush1.bf16.msra.mxu0 %v2828_v11  ;;  %1994 = vmatprep.subr.bf16.mxu1 %v2845_v18  ;;  %v3472_v51 = vsub.s32 0, %v3469_v50  ;;  %v3480_v53 = vsub.s32 1, %v3469_v50  ;;  %v152_v62 = vsub.s32 3, %v3469_v50  ;;  %v156_v10 = vsub.s32 4, %v3469_v50  ;;  %v638_v12 = vld [vmem:[%s4156_s1] sm:$0xff] }
  0x64   :  { %1864 = vmatprep.subr.bf16.mxu0 %v2836_v13  ;;  %v160_v11 = vsub.s32 5, %v3469_v50  ;;  %v643_v13 = vld [vmem:[%s4156_s1 + $0x28] sm:$0xff]  ;;  %v673_v18 = vunpack.c.l.bf16 %v638_v12  ;;  %v693_v49 = vunpack.c.l.bf16 %v648_v16 }
  0x65   :  { %v141_v54 = vrot.slane %v3477_v52, %v3472_v51  ;;  %v145_v55 = vrot.slane %v3477_v52, %v3480_v53  ;;  %v153_v63 = vrot.slane %v3477_v52, %v152_v62  ;;  %v157_v14 = vrot.slane %v3477_v52, %v156_v10 }
  0x66   :  { %1995 = vmatpush1.bf16.msra.mxu1 %v2843_v20 }
  0x67   :  { %1865 = vmatpush1.bf16.msra.mxu0 %v2834_v15  ;;  %1996 = vmatprep.subr.bf16.mxu1 %v2851_v22  ;;  %v161_v15 = vrot.slane %v3477_v52, %v160_v11  ;;  %v674_v22 = vunpack.c.h.bf16 %v638_v12 }
  0x68   :  { %1866 = vmatprep.subr.bf16.mxu0 %v2842_v17  ;;  %v653_v17 = vld [vmem:[%s4156_s1 + $0x78] sm:$0xff] }
  0x6a   :  { %1997 = vmatpush1.bf16.msra.mxu1 %v2849_v24 }
  0x6b   :  { %1867 = vmatpush1.bf16.msra.mxu0 %v2840_v19  ;;  %1998 = vmatprep.subr.bf16.mxu1 %v2857_v26  ;;  %v683_v19 = vunpack.c.l.bf16 %v643_v13 }
  0x6c   :  { %1868 = vmatprep.subr.bf16.mxu0 %v2848_v21 }
  0x6e   :  { %1999 = vmatpush1.bf16.msra.mxu1 %v2855_v28  ;;  %v694_v28 = vunpack.c.h.bf16 %v648_v16  ;;  %v148_v16 = vsub.s32 2, %v3469_v50 }
  0x6f   :  { %1869 = vmatpush1.bf16.msra.mxu0 %v2846_v23  ;;  %2000 = vmatprep.subr.bf16.mxu1 %v2863_v30  ;;  %v684_v23 = vunpack.c.h.bf16 %v643_v13 }
  0x70   :  { %1870 = vmatprep.subr.bf16.mxu0 %v2854_v25 }
  0x72   :  { %2001 = vmatpush1.bf16.msra.mxu1 %v2861_v32 }
  0x73   :  { %1871 = vmatpush1.bf16.msra.mxu0 %v2852_v27  ;;  %2002 = vmatprep.subr.bf16.mxu1 %v2869_v34 }
  0x74   :  { %1872 = vmatprep.subr.bf16.mxu0 %v2860_v29  ;;  %v704_v29 = vunpack.c.h.bf16 %v653_v17 }
  0x76   :  { %2003 = vmatpush1.bf16.msra.mxu1 %v2867_v35 }
  0x77   :  { %1873 = vmatpush1.bf16.msra.mxu0 %v2858_v31  ;;  %2004 = vmatprep.subr.bf16.mxu1 %v2875_v36 }
  0x78   :  { %1913 = vmatprep.subr.bf16.mxu0 %v2866_v33 }
  0x7a   :  { %2005 = vmatpush1.bf16.msra.mxu1 %v2873_v37 }
  0x7b   :  { %2006 = vmatprep.subr.bf16.mxu1 %v2881_v38 }
  0x7e   :  { %2007 = vmatpush1.bf16.msra.mxu1 %v2879_v39 }
  0x7f   :  { %2008 = vmatprep.subr.bf16.mxu1 %v2887_v40 }
  0x82   :  { %2009 = vmatpush1.bf16.msra.mxu1 %v2885_v41 }
  0x83   :  { %2010 = vmatprep.subr.bf16.mxu1 %v2893_v42  ;;  %v658_v42 = vld [vmem:[%s4156_s1 + $0xa0] sm:$0xff] }
  0x84   :  { %v713_v10 = vunpack.c.l.bf16 %v658_v42 }
  0x86   :  { %2011 = vmatpush1.bf16.msra.mxu1 %v2891_v43  ;;  %v663_v43 = vld [vmem:[%s4156_s1 + $0xc8] sm:$0xff] }
  0x87   :  { %2012 = vmatprep.subr.bf16.mxu1 %v2899_v44  ;;  %v723_v11 = vunpack.c.l.bf16 %v663_v43 }
  0x8a   :  { %2013 = vmatpush1.bf16.msra.mxu1 %v2897_v45  ;;  %v2864_v45 = vld [vmem:[%s4159_s4 + $0x100] ss:$8 sps:$4 sm:$0xff]  }
  0x8b   :  { %2014 = vmatprep.subr.bf16.mxu1 %v2905_v46  ;;  %v168_v46 = vsub.s32 7, %v3469_v50 }
  0x8e   :  { %2015 = vmatpush1.bf16.msra.mxu1 %v2903_v47 }
  0x8f   :  { %2055 = vmatprep.subr.bf16.mxu1 %v2911_v48  ;;  %v2872_v48 = vld [vmem:[%s4159_s4 + $0x114] ss:$8 sps:$4 sm:$0xff]  }
  0xe3   :  { %v289_v56 = vpop.f32.mrb[0].mxu0 }
  0xe4   :  { %v290_v57 = vadd.f32 %v289_v56, %v141_v54  ;;  %v291_v58 = vpop.f32.mrb[1].mxu0  ;;  %v703_v54 = vunpack.c.l.bf16 %v653_v17  ;;  %v714_v56 = vunpack.c.h.bf16 %v658_v42 }
  0xe5   :  { %v292_v59 = vadd.f32 %v291_v58, %v145_v55  ;;  %v2870_v58 = vld [vmem:[%s4159_s4 + $0x110] ss:$8 sps:$4 sm:$0xff]  }
  0xe6   :  { %v2417_v60 = vmul.f32 -1.442695, %v290_v57  ;;  %v3490_v7 = vpop.f32.mrb[0].mxu1  ;;  %v724_v57 = vunpack.c.h.bf16 %v663_v43  ;;  %v650_v43 = vld [vmem:[%s4156_s1 + $0x60] sm:$0xff] }
  0xe7   :  { %v2418_v61 = vmul.f32 -1.442695, %v292_v59  ;;  %v3492_v9 = vpop.f32.mrb[1].mxu1  ;;  %v169_v59 = vrot.slane %v3477_v52, %v168_v46  ;;  %v655_v46 = vld [vmem:[%s4156_s1 + $0x88] sm:$0xff] }
  0xe8   :  { %3023 = vpow2.f32 %v2417_v60  ;;  %v2878_v60 = vld [vmem:[%s4159_s4 + $0x124] ss:$8 sps:$4 sm:$0xff]  }
  0xe9   :  { %3025 = vpow2.f32 %v2418_v61 }
  0xf1   :  { %v3488_v0 = vpop.f32.mrb[2].mxu0 }
  0xf2   :  { %v3024_v1 = vpop.eup %3023  ;;  %v362_v2 = vpop.f32.mrb[3].mxu0 }
  0xf3   :  { %v3026_v3 = vpop.eup %3025  ;;  %v608_v4 = vadd.f32 1.0, %v3024_v1  ;;  %v363_v5 = vadd.f32 %v362_v2, %v153_v63  ;;  %v668_v2 = vld [vmem:[%s4156_s1 + $0xf0] sm:$0x11] }
  0xf4   :  { %v609_v6 = vadd.f32 1.0, %v3026_v3  ;;  %v2876_v3 = vld [vmem:[%s4159_s4 + $0x120] ss:$8 sps:$4 sm:$0xff]  }
  0xf5   :  { %3027 = vrcp.f32 %v608_v4  ;;  %v2420_v8 = vmul.f32 -1.442695, %v363_v5  ;;  %v505_v4 = vadd.f32 %v3492_v9, %v169_v59 }
  0xf6   :  { %3029 = vrcp.f32 %v609_v6 }
  0xf7   :  { %3031 = vpow2.f32 %v2420_v8  ;;  %v2884_v8 = vld [vmem:[%s4159_s4 + $0x134] ss:$8 sps:$4 sm:$0xff]  }
  0xff   :  { %v3028_v20 = vpop.eup %3027  ;;  %v431_v21 = vpop.f32.mrb[4].mxu0 }
 0x100   :  { %v3030_v24 = vpop.eup %3029  ;;  %v3511_v25 = vrot.slane %v3028_v20, %v3472_v51  ;;  %v432_v26 = vadd.f32 %v431_v21, %v157_v14  ;;  %v433_v27 = vpop.f32.mrb[5].mxu0  ;;  %v734_v14 = vunpack.c.h.bf16 %v668_v2  ;;  %v2890_v21 = vld [vmem:[%s4159_s4 + $0x144] ss:$8 sps:$4 sm:$0xff]  }
 0x101   :  { %v3514_v30 = vrot.slane %v3030_v24, %v3472_v51  ;;  %v434_v31 = vadd.f32 %v433_v27, %v161_v15  ;;  %v3032_v35 = vpop.eup %3031  ;;  %v149_v27 = vrot.slane %v3477_v52, %v148_v16  ;;  %v665_v16 = vld [vmem:[%s4156_s1 + $0xd8] sm:$0xff] }
 0x102   :  { %v2421_v32 = vmul.f32 -1.442695, %v432_v26  ;;  %v783_v33 = vmul.f32 %v3511_v25, %v673_v18  ;;  %v793_v34 = vmul.f32 %v3511_v25, %v683_v19  ;;  %v611_v47 = vadd.f32 1.0, %v3032_v35  ;;  %v2882_v18 = vld [vmem:[%s4159_s4 + $0x130] ss:$8 sps:$4 sm:$0xff]  }
 0x103   :  { %v2422_v36 = vmul.f32 -1.442695, %v434_v31  ;;  %v784_v37 = vmul.f32 %v3514_v30, %v674_v22  ;;  %v794_v38 = vmul.f32 %v3514_v30, %v684_v23  ;;  %v804_v40 = vmul.f32 %v3514_v30, %v694_v28  ;;  %v3574_v28 = vld [vmem:[%s4156_s1 + $0x8] sm:$0xff] }
 0x104   :  { %v853_v39 = vpack.c.bf16 %v793_v34, %v783_v33  ;;  %v814_v41 = vmul.f32 %v3514_v30, %v704_v29  ;;  %3033 = vpow2.f32 %v2421_v32  ;;  %v803_v61 = vmul.f32 %v3511_v25, %v693_v49  ;;  %v3579_v29 = vld [vmem:[%s4156_s1 + $0x30] sm:$0xff]  ;;  %v2888_v31 = vld [vmem:[%s4159_s4 + $0x140] ss:$8 sps:$4 sm:$0xff]  }
 0x105   :  { %v854_v44 = vpack.c.bf16 %v794_v38, %v784_v37  ;;  %3035 = vpow2.f32 %v2422_v36  ;;  %v813_v62 = vmul.f32 %v3511_v25, %v703_v54  ;;  %v824_v63 = vmul.f32 %v3514_v30, %v714_v56  ;;  %v2896_v32 = vld [vmem:[%s4159_s4 + $0x154] ss:$8 sps:$4 sm:$0xff]  }
 0x106   :  { %v864_v55 = vpack.c.bf16 %v814_v41, %v804_v40  ;;  %3037 = vrcp.f32 %v611_v47  ;;  %v834_v1 = vmul.f32 %v3514_v30, %v724_v57  ;;  %v2424_v19 = vmul.f32 -1.442695, %v505_v4  ;;  %v640_v40 = vld [vmem:[%s4156_s1 + $0x10] sm:$0xff]  ;;  %v645_v41 = vld [vmem:[%s4156_s1 + $0x38] sm:$0xff] }
 0x107   :  { %1874 = vmatprep.mubr.bf16.mxu0 %v854_v44  ;;  %v863_v6 = vpack.c.bf16 %v813_v62, %v803_v61  ;;  %v823_v22 = vmul.f32 %v3511_v25, %v713_v10  ;;  %v833_v23 = vmul.f32 %v3511_v25, %v723_v11  ;;  %v844_v24 = vmul.f32 %v3514_v30, %v734_v14  ;;  %v2908_v61 = vld [vmem:[%s4159_s4 + $0x174] ss:$8 sps:$4 sm:$0xff]   ;;  %v2914_v14 = vld [vmem:[%s4159_s4 + $0x184] ss:$8 sps:$4 sm:$0xff]  }
 0x108   :  { %1875 = vmatmul.mubr.bf16.vlgmr.msra.gmra.mrb[8].mxu0 %v853_v39  ;;  %v874_v13 = vpack.c.bf16 %v834_v1, %v824_v63  ;;  %v733_v33 = vunpack.c.l.bf16 %v668_v2  ;;  %v676_v36 = vunpack.c.h.bf16 %v3574_v28  ;;  %v686_v37 = vunpack.c.h.bf16 %v3579_v29  ;;  %v2894_v39 = vld [vmem:[%s4159_s4 + $0x150] ss:$8 sps:$4 sm:$0xff]  }
 0x109   :  { %1914 = vmatpush1.bf16.msra.mxu0 %v2864_v45  ;;  %1884 = vmatprep.mubr.bf16.mxu0 %v864_v55  ;;  %v873_v30 = vpack.c.bf16 %v833_v23, %v823_v22  ;;  %v884_v35 = vpack.c.bf16 %v844_v24, %v844_v24  ;;  %v361_v38 = vadd.f32 %v3488_v0, %v149_v27  ;;  %v2902_v0 = vld [vmem:[%s4159_s4 + $0x164] ss:$8 sps:$4 sm:$0xff]   ;;  %v687_v49 = vunpack.c.l.bf16 %v645_v41  ;;  %v2912_v24 = vld [vmem:[%s4159_s4 + $0x180] ss:$8 sps:$4 sm:$0xff]  }
 0x10a   :  { %1915 = vmatprep.subr.bf16.mxu0 %v2872_v48  ;;  %v843_v42 = vmul.f32 %v3511_v25, %v733_v33  ;;  %v677_v48 = vunpack.c.l.bf16 %v640_v40  ;;  %v2900_v25 = vld [vmem:[%s4159_s4 + $0x160] ss:$8 sps:$4 sm:$0xff]   ;;  %v678_v55 = vunpack.c.h.bf16 %v640_v40  ;;  %v688_v56 = vunpack.c.h.bf16 %v645_v41  ;;  %v2926_v40 = vld [vmem:[%s4159_s4 + $0x1a4] ss:$8 sps:$4 sm:$0xff]  }
 0x10b   :  { %v2419_v47 = vmul.f32 -1.442695, %v361_v38  ;;  %v698_v57 = vunpack.c.h.bf16 %v650_v43  ;;  %v708_v62 = vunpack.c.h.bf16 %v655_v46  ;;  %v707_v22 = vunpack.c.l.bf16 %v655_v46  ;;  %v670_v41 = vld [vmem:[%s4156_s1 + $0x100] sm:$0x11] }
 0x10c   :  { %v728_v27 = vunpack.c.h.bf16 %v665_v16  ;;  %v164_v46 = vsub.s32 6, %v3469_v50 }
 0x10d   :  { %1916 = vmatpush1.bf16.msra.mxu0 %v2870_v58  ;;  %v3553_v5 = vpop.f32.mrb[6].mxu0 }
 0x10e   :  { %1917 = vmatprep.subr.bf16.mxu0 %v2878_v60  ;;  %v3558_v12 = vpop.f32.mrb[7].mxu0  ;;  %v3034_v15 = vpop.eup %3033  ;;  %v883_v60 = vpack.c.bf16 %v843_v42, %v843_v42 }
 0x10f   :  { %v3036_v17 = vpop.eup %3035  ;;  %v612_v9 = vadd.f32 1.0, %v3034_v15  ;;  %v660_v15 = vld [vmem:[%s4156_s1 + $0xb0] sm:$0xff] }
 0x110   :  { %1885 = vmatmul.mubr.bf16.gmra.mrb[12].mxu0 %v863_v6  ;;  %v613_v20 = vadd.f32 1.0, %v3036_v17  ;;  %v3038_v26 = vpop.eup %3037  ;;  %v2906_v6 = vld [vmem:[%s4159_s4 + $0x170] ss:$8 sps:$4 sm:$0xff]  }
 0x111   :  { %1918 = vmatpush1.bf16.msra.mxu0 %v2876_v3  ;;  %1894 = vmatprep.mubr.bf16.mxu0 %v874_v13  ;;  %3039 = vrcp.f32 %v612_v9  ;;  %v3588_v34 = vrot.slane %v3038_v26, %v3472_v51  ;;  %v718_v26 = vunpack.c.h.bf16 %v660_v15 }
 0x112   :  { %1919 = vmatprep.subr.bf16.mxu0 %v2884_v8  ;;  %3041 = vrcp.f32 %v613_v20  ;;  %v2917_v20 = vld [vmem:[%s4159_s4 + $0x314] ss:$8 sps:$4 sm:$0xff]  }
 0x113   :  { %3043 = vpow2.f32 %v2424_v19  ;;  %v786_v44 = vmul.f32 %v3588_v34, %v676_v36  ;;  %v796_v45 = vmul.f32 %v3588_v34, %v686_v37  ;;  %v2918_v36 = vld [vmem:[%s4159_s4 + $0x190] ss:$8 sps:$4 sm:$0xff]  }
 0x114   :  { %3045 = vpow2.f32 %v2419_v47 }
 0x115   :  { %1920 = vmatpush1.bf16.msra.mxu0 %v2882_v18  ;;  %v856_v2 = vpack.c.bf16 %v796_v45, %v786_v44  ;;  %v2909_v18 = vld [vmem:[%s4159_s4 + $0x300] ss:$8 sps:$4 sm:$0xff]   ;;  %v717_v44 = vunpack.c.l.bf16 %v660_v15  ;;  %v727_v45 = vunpack.c.l.bf16 %v665_v16 }
 0x116   :  { %1921 = vmatprep.subr.bf16.mxu0 %v2890_v21  ;;  %v697_v21 = vunpack.c.l.bf16 %v650_v43  ;;  %v2929_v43 = vld [vmem:[%s4159_s4 + $0x334] ss:$8 sps:$4 sm:$0xff]   ;;  %v2936_v16 = vld [vmem:[%s4159_s4 + $0x1c0] ss:$8 sps:$4 sm:$0xff]  }
 0x118   :  { %1895 = vmatmul.mubr.bf16.gmra.mrb[16].mxu0 %v873_v30  ;;  %v2915_v30 = vld [vmem:[%s4159_s4 + $0x310] ss:$8 sps:$4 sm:$0xff]  }
 0x119   :  { %1922 = vmatpush1.bf16.msra.mxu0 %v2888_v31  ;;  %1904 = vmatprep.mubr.bf16.mxu0 %v884_v35  ;;  %v2920_v31 = vld [vmem:[%s4159_s4 + $0x194] ss:$8 sps:$4 sm:$0xff]  }
 0x11a   :  { %1923 = vmatprep.subr.bf16.mxu0 %v2896_v32  ;;  %v2923_v32 = vld [vmem:[%s4159_s4 + $0x324] ss:$8 sps:$4 sm:$0xff]  }
 0x11b   :  { %v3040_v54 = vpop.eup %3039 }
 0x11c   :  { %v3042_v58 = vpop.eup %3041  ;;  %v3618_v59 = vrot.slane %v3040_v54, %v3472_v51  ;;  %v738_v54 = vunpack.c.h.bf16 %v670_v41 }
 0x11d   :  { %1924 = vmatpush1.bf16.msra.mxu0 %v2894_v39  ;;  %v3044_v63 = vpop.eup %3043  ;;  %v3624_v1 = vrot.slane %v3042_v58, %v3472_v51 }
 0x11e   :  { %1925 = vmatprep.subr.bf16.mxu0 %v2902_v0  ;;  %v787_v3 = vmul.f32 %v3618_v59, %v677_v48  ;;  %v797_v4 = vmul.f32 %v3618_v59, %v687_v49  ;;  %v615_v17 = vadd.f32 1.0, %v3044_v63  ;;  %v807_v33 = vmul.f32 %v3618_v59, %v697_v21  ;;  %v3046_v39 = vpop.eup %3045  ;;  %v2921_v0 = vld [vmem:[%s4159_s4 + $0x320] ss:$8 sps:$4 sm:$0xff]  }
 0x11f   :  { %v788_v8 = vmul.f32 %v3624_v1, %v678_v55  ;;  %v798_v10 = vmul.f32 %v3624_v1, %v688_v56  ;;  %v808_v11 = vmul.f32 %v3624_v1, %v698_v57  ;;  %v818_v13 = vmul.f32 %v3624_v1, %v708_v62  ;;  %v2924_v49 = vld [vmem:[%s4159_s4 + $0x1a0] ss:$8 sps:$4 sm:$0xff]   ;;  %v2927_v55 = vld [vmem:[%s4159_s4 + $0x330] ss:$8 sps:$4 sm:$0xff]   ;;  %v2935_v57 = vld [vmem:[%s4159_s4 + $0x344] ss:$8 sps:$4 sm:$0xff]  }
 0x120   :  { %1905 = vmatmul.mubr.bf16.gmra.mrb[20].mxu0 %v883_v60  ;;  %v857_v19 = vpack.c.bf16 %v797_v4, %v787_v3  ;;  %3047 = vrcp.f32 %v615_v17  ;;  %v817_v35 = vmul.f32 %v3618_v59, %v707_v22  ;;  %v828_v37 = vmul.f32 %v3624_v1, %v718_v26  ;;  %v3700_v62 = vld [vmem:[%s4156_s1 + $0x18] sm:$0xff]  ;;  %v3705_v63 = vld [vmem:[%s4156_s1 + $0x40] sm:$0xff] }
 0x121   :  { %1926 = vmatpush1.bf16.msra.mxu0 %v2900_v25  ;;  %1945 = vmatprep.mubr.bf16.mxu0 %v856_v2  ;;  %v858_v9 = vpack.c.bf16 %v798_v10, %v788_v8  ;;  %v868_v23 = vpack.c.bf16 %v818_v13, %v808_v11  ;;  %v838_v38 = vmul.f32 %v3624_v1, %v728_v27  ;;  %v610_v47 = vadd.f32 1.0, %v3046_v39  ;;  %v2932_v25 = vld [vmem:[%s4159_s4 + $0x1b4] ss:$8 sps:$4 sm:$0xff]   ;;  %v2930_v2 = vld [vmem:[%s4159_s4 + $0x1b0] ss:$8 sps:$4 sm:$0xff]  }
 0x122   :  { %1927 = vmatprep.subr.bf16.mxu0 %v2908_v61  ;;  %v867_v42 = vpack.c.bf16 %v817_v35, %v807_v33  ;;  %v827_v58 = vmul.f32 %v3618_v59, %v717_v44  ;;  %v837_v60 = vmul.f32 %v3618_v59, %v727_v45  ;;  %v165_v61 = vrot.slane %v3477_v52, %v164_v46  ;;  %v2938_v52 = vld [vmem:[%s4159_s4 + $0x1c4] ss:$8 sps:$4 sm:$0xff]   ;;  %v2933_v4 = vld [vmem:[%s4159_s4 + $0x340] ss:$8 sps:$4 sm:$0xff]   ;;  %v2944_v17 = vld [vmem:[%s4159_s4 + $0x1d4] ss:$8 sps:$4 sm:$0xff]  }
 0x123   :  { %2016 = vmatprep.mubr.bf16.mxu1 %v858_v9  ;;  %v878_v48 = vpack.c.bf16 %v838_v38, %v828_v37  ;;  %3049 = vrcp.f32 %v610_v47  ;;  %v848_v3 = vmul.f32 %v3624_v1, %v738_v54  ;;  %v680_v8 = vunpack.c.h.bf16 %v3700_v62  ;;  %v2941_v1 = vld [vmem:[%s4159_s4 + $0x354] ss:$8 sps:$4 sm:$0xff]   ;;  %v2939_v9 = vld [vmem:[%s4159_s4 + $0x350] ss:$8 sps:$4 sm:$0xff]   ;;  %v2945_v26 = vld [vmem:[%s4159_s4 + $0x360] ss:$8 sps:$4 sm:$0xff]  }
 0x124   :  { %2017 = vmatmul.mubr.bf16.vlgmr.msra.gmra.mrb[4].mxu1 %v857_v19  ;;  %v690_v10 = vunpack.c.h.bf16 %v3705_v63  ;;  %v877_v11 = vpack.c.bf16 %v837_v60, %v827_v58  ;;  %v737_v13 = vunpack.c.l.bf16 %v670_v41  ;;  %v2947_v19 = vld [vmem:[%s4159_s4 + $0x364] ss:$8 sps:$4 sm:$0xff]   ;;  %v2942_v22 = vld [vmem:[%s4159_s4 + $0x1d0] ss:$8 sps:$4 sm:$0xff]   ;;  %v2948_v33 = vld [vmem:[%s4159_s4 + $0x1e0] ss:$8 sps:$4 sm:$0xff]   ;;  %v685_v37 = vunpack.c.l.bf16 %v3579_v29 }
 0x125   :  { %1928 = vmatpush1.bf16.msra.mxu0 %v2906_v6  ;;  %2056 = vmatpush1.bf16.msra.mxu1 %v2909_v18  ;;  %v888_v15 = vpack.c.bf16 %v848_v3, %v848_v3  ;;  %v2956_v38 = vld [vmem:[%s4159_s4 + $0x1f4] ss:$8 sps:$4 sm:$0xff]   ;;  %v2951_v39 = vld [vmem:[%s4159_s4 + $0x370] ss:$8 sps:$4 sm:$0xff]   ;;  %v659_v47 = vld [vmem:[%s4156_s1 + $0xa8] sm:$0xff] }
 0x126   :  { %1929 = vmatprep.subr.bf16.mxu0 %v2914_v14  ;;  %2026 = vmatprep.mubr.bf16.mxu1 %v868_v23  ;;  %v503_v14 = vadd.f32 %v3490_v7, %v165_v61  ;;  %v2950_v23 = vld [vmem:[%s4159_s4 + $0x1e4] ss:$8 sps:$4 sm:$0xff]   ;;  %v2954_v29 = vld [vmem:[%s4159_s4 + $0x1f0] ss:$8 sps:$4 sm:$0xff]   ;;  %v2962_v46 = vld [vmem:[%s4159_s4 + $0x394] ss:$8 sps:$4 sm:$0xff]   ;;  %v716_v60 = vunpack.c.h.bf16 %v659_v47 }
 0x127   :  { %2057 = vmatprep.subr.bf16.mxu1 %v2917_v20  ;;  %v847_v20 = vmul.f32 %v3618_v59, %v737_v13  ;;  %v2968_v13 = vld [vmem:[%s4159_s4 + $0x3b4] ss:$8 sps:$4 sm:$0xff]  }
 0x128   :  { %v2423_v21 = vmul.f32 -1.442695, %v503_v14  ;;  %v669_v14 = vld [vmem:[%s4156_s1 + $0xf8] sm:$0x11] }
 0x129   :  { %1930 = vmatpush1.bf16.msra.mxu0 %v2912_v24  ;;  %2058 = vmatpush1.bf16.msra.mxu1 %v2915_v30  ;;  %v887_v59 = vpack.c.bf16 %v847_v20, %v847_v20  ;;  %v649_v30 = vld [vmem:[%s4156_s1 + $0x58] sm:$0xff]  ;;  %v2971_v20 = vld [vmem:[%s4159_s4 + $0x3c4] ss:$8 sps:$4 sm:$0xff]  }
 0x12a   :  { %1931 = vmatprep.subr.bf16.mxu0 %v2920_v31  ;;  %2059 = vmatprep.subr.bf16.mxu1 %v2923_v32  ;;  %v3048_v56 = vpop.eup %3047  ;;  %3051 = vpow2.f32 %v2423_v21  ;;  %v2953_v31 = vld [vmem:[%s4159_s4 + $0x374] ss:$8 sps:$4 sm:$0xff]   ;;  %v654_v32 = vld [vmem:[%s4156_s1 + $0x80] sm:$0xff] }
 0x12b   :  { %v3718_v6 = vrot.slane %v3048_v56, %v3472_v51  ;;  %v706_v41 = vunpack.c.h.bf16 %v654_v32  ;;  %v3798_v56 = vld [vmem:[%s4158_s3 + $0x8] sm:$0x3] }
 0x12c   :  { %2027 = vmatmul.mubr.bf16.gmra.mrb[8].mxu1 %v867_v42 }
 0x12d   :  { %1932 = vmatpush1.bf16.msra.mxu0 %v2918_v36  ;;  %2060 = vmatpush1.bf16.msra.mxu1 %v2921_v0  ;;  %v790_v7 = vmul.f32 %v3718_v6, %v680_v8  ;;  %v800_v18 = vmul.f32 %v3718_v6, %v690_v10  ;;  %v3050_v24 = vpop.eup %3049  ;;  %v675_v36 = vunpack.c.l.bf16 %v3574_v28  ;;  %v2959_v28 = vld [vmem:[%s4159_s4 + $0x384] ss:$8 sps:$4 sm:$0xff]   ;;  %v816_v45 = vmul.f32 %v3588_v34, %v706_v41  ;;  %v2963_v10 = vld [vmem:[%s4159_s4 + $0x3a0] ss:$8 sps:$4 sm:$0xff]  }
 0x12e   :  { %1933 = vmatprep.subr.bf16.mxu0 %v2926_v40  ;;  %2036 = vmatprep.mubr.bf16.mxu1 %v878_v48  ;;  %v3763_v35 = vrot.slane %v3050_v24, %v3472_v51  ;;  %v696_v40 = vunpack.c.h.bf16 %v649_v30  ;;  %v664_v48 = vld [vmem:[%s4156_s1 + $0xd0] sm:$0xff]  ;;  %v2975_v41 = vld [vmem:[%s4159_s4 + $0x3e0] ss:$8 sps:$4 sm:$0xff]  }
 0x12f   :  { %2061 = vmatprep.subr.bf16.mxu1 %v2929_v43  ;;  %v860_v27 = vpack.c.bf16 %v800_v18, %v790_v7  ;;  %v2957_v43 = vld [vmem:[%s4159_s4 + $0x380] ss:$8 sps:$4 sm:$0xff]   ;;  %v726_v61 = vunpack.c.h.bf16 %v664_v48  ;;  %v2966_v7 = vld [vmem:[%s4159_s4 + $0x3b0] ss:$8 sps:$4 sm:$0xff]  }
 0x130   :  { %v785_v0 = vmul.f32 %v3763_v35, %v675_v36  ;;  %v795_v42 = vmul.f32 %v3763_v35, %v685_v37  ;;  %v806_v44 = vmul.f32 %v3588_v34, %v696_v40  ;;  %v679_v37 = vunpack.c.l.bf16 %v3700_v62  ;;  %v656_v40 = vld [vmem:[%s4156_s1 + $0x90] sm:$0xff] }
 0x131   :  { %1934 = vmatpush1.bf16.msra.mxu0 %v2924_v49  ;;  %2062 = vmatpush1.bf16.msra.mxu1 %v2927_v55  ;;  %v705_v55 = vunpack.c.l.bf16 %v654_v32  ;;  %v2980_v62 = vld [vmem:[%s4159_s4 + $0x3f4] ss:$8 sps:$4 sm:$0xff]  }
 0x132   :  { %1935 = vmatprep.subr.bf16.mxu0 %v2932_v25  ;;  %2063 = vmatprep.subr.bf16.mxu1 %v2935_v57  ;;  %v855_v54 = vpack.c.bf16 %v795_v42, %v785_v0  ;;  %v695_v25 = vunpack.c.l.bf16 %v649_v30  ;;  %v2960_v57 = vld [vmem:[%s4159_s4 + $0x390] ss:$8 sps:$4 sm:$0xff]   ;;  %v866_v58 = vpack.c.bf16 %v816_v45, %v806_v44  ;;  %v2983_v44 = vld [vmem:[%s4159_s4 + $0x404] ss:$8 sps:$4 sm:$0xff]  }
 0x133   :  { %v815_v8 = vmul.f32 %v3763_v35, %v705_v55  ;;  %v2972_v30 = vld [vmem:[%s4159_s4 + $0x3d0] ss:$8 sps:$4 sm:$0xff]   ;;  %v2986_v55 = vld [vmem:[%s4159_s4 + $0x414] ss:$8 sps:$4 sm:$0xff]  }
 0x134   :  { %2037 = vmatmul.mubr.bf16.gmra.mrb[12].mxu1 %v877_v11  ;;  %v3052_v49 = vpop.eup %3051  ;;  %v826_v11 = vmul.f32 %v3588_v34, %v716_v60 }
 0x135   :  { %1936 = vmatpush1.bf16.msra.mxu0 %v2930_v2  ;;  %2064 = vmatpush1.bf16.msra.mxu1 %v2933_v4  ;;  %v2965_v2 = vld [vmem:[%s4159_s4 + $0x3a4] ss:$8 sps:$4 sm:$0xff]   ;;  %v614_v3 = vadd.f32 1.0, %v3052_v49  ;;  %v805_v4 = vmul.f32 %v3763_v35, %v695_v25  ;;  %v2981_v25 = vld [vmem:[%s4159_s4 + $0x400] ss:$8 sps:$4 sm:$0xff]  }
 0x136   :  { %1937 = vmatprep.subr.bf16.mxu0 %v2938_v52  ;;  %2046 = vmatprep.mubr.bf16.mxu1 %v888_v15  ;;  %v177_v52 = vrot.slane %v3798_v56, %v3480_v53  ;;  %v666_v49 = vld [vmem:[%s4156_s1 + $0xe0] sm:$0xff] }
 0x137   :  { %2065 = vmatprep.subr.bf16.mxu1 %v2941_v1  ;;  %v836_v1 = vmul.f32 %v3588_v34, %v726_v61  ;;  %3053 = vrcp.f32 %v614_v3  ;;  %v2984_v3 = vld [vmem:[%s4159_s4 + $0x410] ss:$8 sps:$4 sm:$0xff]  }
 0x138   :  { %v576_v15 = vadd.f32 %v3558_v12, %v177_v52 }
 0x139   :  { %1938 = vmatpush1.bf16.msra.mxu0 %v2936_v16  ;;  %2066 = vmatpush1.bf16.msra.mxu1 %v2939_v9  ;;  %v865_v16 = vpack.c.bf16 %v815_v8, %v805_v4  ;;  %v725_v9 = vunpack.c.l.bf16 %v664_v48  ;;  %v876_v18 = vpack.c.bf16 %v836_v1, %v826_v11  ;;  %v661_v48 = vld [vmem:[%s4156_s1 + $0xb8] sm:$0xff]  ;;  %v2989_v8 = vld [vmem:[%s4159_s4 + $0x424] ss:$8 sps:$4 sm:$0xff]  }
 0x13a   :  { %1939 = vmatprep.subr.bf16.mxu0 %v2944_v17  ;;  %2067 = vmatprep.subr.bf16.mxu1 %v2947_v19  ;;  %v715_v17 = vunpack.c.l.bf16 %v659_v47  ;;  %v736_v19 = vunpack.c.h.bf16 %v669_v14  ;;  %v2426_v21 = vmul.f32 -1.442695, %v576_v15  ;;  %v720_v61 = vunpack.c.h.bf16 %v661_v48  ;;  %v671_v1 = vld [vmem:[%s4156_s1 + $0x108] sm:$0x11] }
 0x13c   :  { %2047 = vmatmul.mubr.bf16.gmra.mrb[16].mxu1 %v887_v59  ;;  %v825_v12 = vmul.f32 %v3763_v35, %v715_v17  ;;  %v846_v24 = vmul.f32 %v3588_v34, %v736_v19  ;;  %3055 = vpow2.f32 %v2426_v21  ;;  %v735_v59 = vunpack.c.l.bf16 %v669_v14  ;;  %v2977_v34 = vld [vmem:[%s4159_s4 + $0x3e4] ss:$8 sps:$4 sm:$0xff]   ;;  %v2987_v14 = vld [vmem:[%s4159_s4 + $0x420] ss:$8 sps:$4 sm:$0xff]  }
 0x13d   :  { %1940 = vmatpush1.bf16.msra.mxu0 %v2942_v22  ;;  %2068 = vmatpush1.bf16.msra.mxu1 %v2945_v26  ;;  %v835_v22 = vmul.f32 %v3763_v35, %v725_v9  ;;  %v2974_v26 = vld [vmem:[%s4159_s4 + $0x3d4] ss:$8 sps:$4 sm:$0xff]   ;;  %v719_v17 = vunpack.c.l.bf16 %v661_v48  ;;  %v729_v9 = vunpack.c.l.bf16 %v666_v49 }
 0x13e   :  { %1941 = vmatprep.subr.bf16.mxu0 %v2950_v23  ;;  %2087 = vmatprep.mubr.bf16.mxu1 %v860_v27  ;;  %v2969_v23 = vld [vmem:[%s4159_s4 + $0x3c0] ss:$8 sps:$4 sm:$0xff]   ;;  %v886_v32 = vpack.c.bf16 %v846_v24, %v846_v24  ;;  %v845_v36 = vmul.f32 %v3763_v35, %v735_v59  ;;  %v3016_v48 = vld [vmem:[%s4159_s4 + $0x4b4] ss:$8 sps:$4 sm:$0xff]  }
 0x13f   :  { %2069 = vmatprep.subr.bf16.mxu1 %v2953_v31  ;;  %v875_v27 = vpack.c.bf16 %v835_v22, %v825_v12  ;;  %v2995_v22 = vld [vmem:[%s4159_s4 + $0x444] ss:$8 sps:$4 sm:$0xff]  }
 0x141   :  { %1942 = vmatpush1.bf16.msra.mxu0 %v2948_v33  ;;  %2070 = vmatpush1.bf16.msra.mxu1 %v2951_v39  ;;  %v3054_v31 = vpop.eup %3053  ;;  %v651_v39 = vld [vmem:[%s4156_s1 + $0x68] sm:$0xff] }
 0x142   :  { %1943 = vmatprep.subr.bf16.mxu0 %v2956_v38  ;;  %2071 = vmatprep.subr.bf16.mxu1 %v2959_v28  ;;  %v3844_v33 = vrot.slane %v3054_v31, %v3472_v51  ;;  %v689_v38 = vunpack.c.l.bf16 %v3705_v63  ;;  %v700_v35 = vunpack.c.h.bf16 %v651_v39  ;;  %v710_v63 = vunpack.c.h.bf16 %v656_v40 }
 0x143   :  { %v885_v28 = vpack.c.bf16 %v845_v36, %v845_v36 }
 0x144   :  { %v799_v0 = vmul.f32 %v3844_v33, %v689_v38  ;;  %v810_v45 = vmul.f32 %v3718_v6, %v700_v35  ;;  %v829_v21 = vmul.f32 %v3844_v33, %v719_v17  ;;  %v839_v12 = vmul.f32 %v3844_v33, %v729_v9 }
 0x145   :  { %1944 = vmatpush1.bf16.msra.mxu0 %v2954_v29  ;;  %2072 = vmatpush1.bf16.msra.mxu1 %v2957_v43  ;;  %v789_v29 = vmul.f32 %v3844_v33, %v679_v37  ;;  %v2978_v43 = vld [vmem:[%s4159_s4 + $0x3f0] ss:$8 sps:$4 sm:$0xff]  }
 0x146   :  { %2073 = vmatprep.subr.bf16.mxu1 %v2962_v46  ;;  %v3056_v42 = vpop.eup %3055  ;;  %v820_v46 = vmul.f32 %v3718_v6, %v710_v63  ;;  %v2996_v37 = vld [vmem:[%s4159_s4 + $0x450] ss:$8 sps:$4 sm:$0xff]  }
 0x147   :  { %v859_v47 = vpack.c.bf16 %v799_v0, %v789_v29  ;;  %v3007_v0 = vld [vmem:[%s4159_s4 + $0x484] ss:$8 sps:$4 sm:$0xff]  }
 0x148   :  { %1946 = vmatmul.mubr.bf16.vlgmr.msra.gmra.mrb[8].mxu0 %v855_v54  ;;  %v617_v54 = vadd.f32 1.0, %v3056_v42  ;;  %v870_v60 = vpack.c.bf16 %v820_v46, %v810_v45  ;;  %v3008_v45 = vld [vmem:[%s4159_s4 + $0x490] ss:$8 sps:$4 sm:$0xff]   ;;  %v3013_v46 = vld [vmem:[%s4159_s4 + $0x4a4] ss:$8 sps:$4 sm:$0xff]  }
 0x149   :  { %1955 = vmatprep.mubr.bf16.mxu0 %v866_v58  ;;  %2074 = vmatpush1.bf16.msra.mxu1 %v2960_v57  ;;  %v699_v57 = vunpack.c.l.bf16 %v651_v39  ;;  %v709_v58 = vunpack.c.l.bf16 %v656_v40 }
 0x14a   :  { %2075 = vmatprep.subr.bf16.mxu1 %v2965_v2  ;;  %v730_v2 = vunpack.c.h.bf16 %v666_v49  ;;  %3057 = vrcp.f32 %v617_v54  ;;  %v3014_v49 = vld [vmem:[%s4159_s4 + $0x4b0] ss:$8 sps:$4 sm:$0xff]   ;;  %v3019_v54 = vld [vmem:[%s4159_s4 + $0x4c4] ss:$8 sps:$4 sm:$0xff]  }
 0x14b   :  { %v809_v52 = vmul.f32 %v3844_v33, %v699_v57  ;;  %v819_v4 = vmul.f32 %v3844_v33, %v709_v58  ;;  %v657_v57 = vld [vmem:[%s4156_s1 + $0x98] sm:$0xff]  ;;  %v3017_v58 = vld [vmem:[%s4159_s4 + $0x4c0] ss:$8 sps:$4 sm:$0xff]  }
 0x14c   :  { %v840_v11 = vmul.f32 %v3718_v6, %v730_v2  ;;  %v711_v9 = vunpack.c.l.bf16 %v657_v57 }
 0x14d   :  { %2076 = vmatpush1.bf16.msra.mxu1 %v2963_v10  ;;  %v830_v10 = vmul.f32 %v3718_v6, %v720_v61  ;;  %v869_v15 = vpack.c.bf16 %v819_v4, %v809_v52  ;;  %v3022_v61 = vld [vmem:[%s4159_s4 + $0x4d4] ss:$8 sps:$4 sm:$0xff]   ;;  %v712_v4 = vunpack.c.h.bf16 %v657_v57 }
 0x14e   :  { %2077 = vmatprep.subr.bf16.mxu1 %v2968_v13  ;;  %v173_v13 = vrot.slane %v3798_v56, %v3472_v51  ;;  %v2990_v56 = vld [vmem:[%s4159_s4 + $0x430] ss:$8 sps:$4 sm:$0xff]  }
 0x150   :  { %1956 = vmatmul.mubr.bf16.gmra.mrb[12].mxu0 %v865_v16  ;;  %v2992_v16 = vld [vmem:[%s4159_s4 + $0x434] ss:$8 sps:$4 sm:$0xff]   ;;  %v574_v19 = vadd.f32 %v3553_v5, %v173_v13  ;;  %v3916_v5 = vld [vmem:[%s4156_s1 + $0x20] sm:$0xff] }
 0x151   :  { %1965 = vmatprep.mubr.bf16.mxu0 %v876_v18  ;;  %2078 = vmatpush1.bf16.msra.mxu1 %v2966_v7  ;;  %v880_v7 = vpack.c.bf16 %v840_v11, %v830_v10  ;;  %v740_v18 = vunpack.c.h.bf16 %v671_v1  ;;  %v682_v31 = vunpack.c.h.bf16 %v3916_v5  ;;  %v681_v2 = vunpack.c.l.bf16 %v3916_v5 }
 0x152   :  { %2079 = vmatprep.subr.bf16.mxu1 %v2971_v20 }
 0x153   :  { %v850_v24 = vmul.f32 %v3718_v6, %v740_v18  ;;  %v739_v6 = vunpack.c.l.bf16 %v671_v1 }
 0x154   :  { %v3058_v20 = vpop.eup %3057 }
 0x155   :  { %2080 = vmatpush1.bf16.msra.mxu1 %v2969_v23  ;;  %v3921_v23 = vld [vmem:[%s4156_s1 + $0x48] sm:$0xff]  ;;  %v3928_v59 = vrot.slane %v3058_v20, %v3472_v51  ;;  %v890_v36 = vpack.c.bf16 %v850_v24, %v850_v24  ;;  %v849_v40 = vmul.f32 %v3844_v33, %v739_v6  ;;  %v3002_v33 = vld [vmem:[%s4159_s4 + $0x470] ss:$8 sps:$4 sm:$0xff]  }
 0x156   :  { %2081 = vmatprep.subr.bf16.mxu1 %v2974_v26  ;;  %v2425_v26 = vmul.f32 -1.442695, %v574_v19 }
 0x157   :  { %v792_v38 = vmul.f32 %v3928_v59, %v682_v31  ;;  %v889_v63 = vpack.c.bf16 %v849_v40, %v849_v40  ;;  %v822_v13 = vmul.f32 %v3928_v59, %v712_v4 }
 0x158   :  { %1966 = vmatmul.mubr.bf16.gmra.mrb[16].mxu0 %v875_v27  ;;  %v2993_v27 = vld [vmem:[%s4159_s4 + $0x440] ss:$8 sps:$4 sm:$0xff]   ;;  %3059 = vpow2.f32 %v2425_v26 }
 0x159   :  { %1975 = vmatprep.mubr.bf16.mxu0 %v886_v32  ;;  %2082 = vmatpush1.bf16.msra.mxu1 %v2972_v30  ;;  %v692_v30 = vunpack.c.h.bf16 %v3921_v23  ;;  %v879_v32 = vpack.c.bf16 %v839_v12, %v829_v21 }
 0x15a   :  { %2083 = vmatprep.subr.bf16.mxu1 %v2977_v34  ;;  %v2998_v34 = vld [vmem:[%s4159_s4 + $0x454] ss:$8 sps:$4 sm:$0xff]  }
 0x15b   :  { %v802_v39 = vmul.f32 %v3928_v59, %v692_v30 }
 0x15d   :  { %2084 = vmatpush1.bf16.msra.mxu1 %v2975_v41  ;;  %v3001_v41 = vld [vmem:[%s4159_s4 + $0x464] ss:$8 sps:$4 sm:$0xff]   ;;  %v862_v35 = vpack.c.bf16 %v802_v39, %v792_v38 }
 0x15e   :  { %2085 = vmatprep.subr.bf16.mxu1 %v2980_v62  ;;  %v2999_v62 = vld [vmem:[%s4159_s4 + $0x460] ss:$8 sps:$4 sm:$0xff]  }
 0x160   :  { %1976 = vmatmul.mubr.bf16.gmra.mrb[20].mxu0 %v885_v28  ;;  %v3004_v28 = vld [vmem:[%s4159_s4 + $0x474] ss:$8 sps:$4 sm:$0xff]  }
 0x161   :  { %2086 = vmatpush1.bf16.msra.mxu1 %v2978_v43  ;;  %v3005_v43 = vld [vmem:[%s4159_s4 + $0x480] ss:$8 sps:$4 sm:$0xff]  }
 0x162   :  { %2126 = vmatprep.subr.bf16.mxu1 %v2983_v44  ;;  %v3060_v29 = vpop.eup %3059  ;;  %v3010_v44 = vld [vmem:[%s4159_s4 + $0x494] ss:$8 sps:$4 sm:$0xff]  }
 0x163   :  { %v616_v42 = vadd.f32 1.0, %v3060_v29 }
 0x164   :  { %2088 = vmatmul.mubr.bf16.vlgmr.msra.gmra.mrb[4].mxu1 %v859_v47  ;;  %v3011_v47 = vld [vmem:[%s4159_s4 + $0x4a0] ss:$8 sps:$4 sm:$0xff]  }
 0x165   :  { %2097 = vmatprep.mubr.bf16.mxu1 %v870_v60  ;;  %2127 = vmatpush1.bf16.msra.mxu1 %v2981_v25  ;;  %3061 = vrcp.f32 %v616_v42 }
 0x166   :  { %2128 = vmatprep.subr.bf16.mxu1 %v2986_v55  ;;  %v652_v55 = vld [vmem:[%s4156_s1 + $0x70] sm:$0xff] }
 0x167   :  { %v702_v52 = vunpack.c.h.bf16 %v652_v55  ;;  %v701_v17 = vunpack.c.l.bf16 %v652_v55 }
 0x169   :  { %2129 = vmatpush1.bf16.msra.mxu1 %v2984_v3  ;;  %v691_v3 = vunpack.c.l.bf16 %v3921_v23  ;;  %v812_v1 = vmul.f32 %v3928_v59, %v702_v52 }
 0x16a   :  { %2130 = vmatprep.subr.bf16.mxu1 %v2989_v8  ;;  %v3020_v8 = vld [vmem:[%s4159_s4 + $0x4d0] ss:$8 sps:$4 sm:$0xff]  }
 0x16c   :  { %2098 = vmatmul.mubr.bf16.gmra.mrb[8].mxu1 %v869_v15  ;;  %v667_v15 = vld [vmem:[%s4156_s1 + $0xe8] sm:$0xff] }
 0x16d   :  { %2107 = vmatprep.mubr.bf16.mxu1 %v880_v7  ;;  %2131 = vmatpush1.bf16.msra.mxu1 %v2987_v14  ;;  %v662_v14 = vld [vmem:[%s4156_s1 + $0xc0] sm:$0xff]  ;;  %v872_v7 = vpack.c.bf16 %v822_v13, %v812_v1  ;;  %v732_v19 = vunpack.c.h.bf16 %v667_v15  ;;  %v731_v24 = vunpack.c.l.bf16 %v667_v15 }
 0x16e   :  { %2132 = vmatprep.subr.bf16.mxu1 %v2992_v16  ;;  %v722_v18 = vunpack.c.h.bf16 %v662_v14  ;;  %v721_v23 = vunpack.c.l.bf16 %v662_v14 }
 0x16f   :  { %v3062_v25 = vpop.eup %3061  ;;  %v842_v12 = vmul.f32 %v3928_v59, %v732_v19 }
 0x170   :  { %v778_v60 = vrot.slane %v3062_v25, %v3472_v51  ;;  %v832_v21 = vmul.f32 %v3928_v59, %v722_v18 }
 0x171   :  { %2133 = vmatpush1.bf16.msra.mxu1 %v2990_v56 }
 0x172   :  { %2134 = vmatprep.subr.bf16.mxu1 %v2995_v22  ;;  %v791_v10 = vmul.f32 %v778_v60, %v681_v2  ;;  %v801_v11 = vmul.f32 %v778_v60, %v691_v3  ;;  %v811_v56 = vmul.f32 %v778_v60, %v701_v17  ;;  %v821_v20 = vmul.f32 %v778_v60, %v711_v9  ;;  %v672_v22 = vld [vmem:[%s4156_s1 + $0x110] sm:$0x11] }
 0x173   :  { %v882_v26 = vpack.c.bf16 %v842_v12, %v832_v21  ;;  %v831_v31 = vmul.f32 %v778_v60, %v721_v23  ;;  %v841_v30 = vmul.f32 %v778_v60, %v731_v24  ;;  %v741_v6 = vunpack.c.l.bf16 %v672_v22 }
 0x174   :  { %2108 = vmatmul.mubr.bf16.gmra.mrb[12].mxu1 %v879_v32  ;;  %v861_v16 = vpack.c.bf16 %v801_v11, %v791_v10  ;;  %v871_v5 = vpack.c.bf16 %v821_v20, %v811_v56 }
 0x175   :  { %2117 = vmatprep.mubr.bf16.mxu1 %v890_v36  ;;  %2135 = vmatpush1.bf16.msra.mxu1 %v2993_v27  ;;  %v742_v27 = vunpack.c.h.bf16 %v672_v22 }
 0x176   :  { %2136 = vmatprep.subr.bf16.mxu1 %v2998_v34  ;;  %v881_v34 = vpack.c.bf16 %v841_v30, %v831_v31 }
 0x177   :  { %v852_v32 = vmul.f32 %v3928_v59, %v742_v27 }
 0x179   :  { %2137 = vmatpush1.bf16.msra.mxu1 %v2996_v37  ;;  %v892_v36 = vpack.c.bf16 %v852_v32, %v852_v32  ;;  %v851_v37 = vmul.f32 %v778_v60, %v741_v6 }
 0x17a   :  { %2138 = vmatprep.subr.bf16.mxu1 %v3001_v41 }
 0x17b   :  { %v891_v38 = vpack.c.bf16 %v851_v37, %v851_v37 }
 0x17c   :  { %2118 = vmatmul.mubr.bf16.gmra.mrb[16].mxu1 %v889_v63 }
 0x17d   :  { %2139 = vmatpush1.bf16.msra.mxu1 %v2999_v62  ;;  %2583 = vmatprep.mubr.msk.bf16.mxu1 %vm1829_vm2, %v862_v35 }
 0x17e   :  { %2140 = vmatprep.subr.bf16.mxu1 %v3004_v28 }
 0x181   :  { %2141 = vmatpush1.bf16.msra.mxu1 %v3002_v33 }
 0x182   :  { %2142 = vmatprep.subr.bf16.mxu1 %v3007_v0 }
 0x185   :  { %2143 = vmatpush1.bf16.msra.mxu1 %v3005_v43 }
 0x186   :  { %2144 = vmatprep.subr.bf16.mxu1 %v3010_v44 }
 0x189   :  { %2145 = vmatpush1.bf16.msra.mxu1 %v3008_v45 }
 0x18a   :  { %2146 = vmatprep.subr.bf16.mxu1 %v3013_v46 }
 0x18d   :  { %2147 = vmatpush1.bf16.msra.mxu1 %v3011_v47 }
 0x18e   :  { %2148 = vmatprep.subr.bf16.mxu1 %v3016_v48 }
 0x191   :  { %2149 = vmatpush1.bf16.msra.mxu1 %v3014_v49 }
 0x192   :  { %2150 = vmatprep.subr.bf16.mxu1 %v3019_v54 }
 0x195   :  { %2151 = vmatpush1.bf16.msra.mxu1 %v3017_v58 }
 0x196   :  { %2152 = vmatprep.subr.bf16.mxu1 %v3022_v61 }
 0x199   :  { %2153 = vmatpush1.bf16.msra.mxu1 %v3020_v8 }
 0x19c   :  { %2159 = vmatmul.mubr.bf16.vlgmr.msra.gmra.mrb[4].mxu1 %v861_v16 }
 0x19d   :  { %2584 = vmatprep.mubr.msk.bf16.mxu1 %vm1829_vm2, %v872_v7 }
 0x1a4   :  { %2169 = vmatmul.mubr.bf16.gmra.mrb[8].mxu1 %v871_v5 }
 0x1a5   :  { %2585 = vmatprep.mubr.msk.bf16.mxu1 %vm1829_vm2, %v882_v26 }
 0x1ac   :  { %2179 = vmatmul.mubr.bf16.gmra.mrb[12].mxu1 %v881_v34 }
 0x1ad   :  { %2586 = vmatprep.mubr.msk.bf16.mxu1 %vm1829_vm2, %v892_v36 }
 0x1b4   :  { %2189 = vmatmul.mubr.bf16.gmra.mrb[16].mxu1 %v891_v38 }
 0x21b   :  { %v1947_v39 = vpop.f32.mrb[8].mxu0 }
 0x21c   :  { %v1949_v40 = vpop.f32.mrb[9].mxu0 }
 0x21d   :  { %v1951_v41 = vpop.f32.mrb[10].mxu0 }
 0x21e   :  { %v1953_v62 = vpop.f32.mrb[11].mxu0 }
 0x223   :  { %v1957_v35 = vpop.f32.mrb[12].mxu0 }
 0x224   :  { %v1959_v63 = vpop.f32.mrb[13].mxu0 }
 0x225   :  { %v1961_v28 = vpop.f32.mrb[14].mxu0 }
 0x226   :  { %v1963_v33 = vpop.f32.mrb[15].mxu0 }
 0x22b   :  { %v1967_v29 = vpop.f32.mrb[16].mxu0 }
 0x22c   :  { %v1969_v0 = vpop.f32.mrb[17].mxu0 }
 0x22d   :  { %v1971_v59 = vpop.f32.mrb[18].mxu0 }
 0x22e   :  { %v1973_v42 = vpop.f32.mrb[19].mxu0 }
 0x233   :  { %v1977_v43 = vpop.f32.mrb[20].mxu0 }
 0x234   :  { %v1979_v44 = vpop.f32.mrb[21].mxu0 }
 0x235   :  { %v1981_v45 = vpop.f32.mrb[22].mxu0 }
 0x236   :  { %v1982_v46 = vpop.f32.mrb[23].mxu0 }
 0x26f   :  { %v2160_v47 = vpop.f32.mrb[4].mxu1 }
 0x270   :  { %v4016_v48 = vadd.f32 %v2160_v47, %v1947_v39  ;;  %v2162_v49 = vpop.f32.mrb[5].mxu1 }
 0x271   :  { %v4018_v54 = vadd.f32 %v2162_v49, %v1949_v40  ;;  %v2164_v25 = vpop.f32.mrb[6].mxu1 }
 0x272   :  { %v2649_v55 = vadd.f32 %v2164_v25, %v1951_v41  ;;  %v2166_v57 = vpop.f32.mrb[7].mxu1 }
 0x273   :  { %v4020_v58 = vadd.f32 %v2166_v57, %v1953_v62  ;;  %v2212_v61 = vsel %vm2211_vm3, %v4018_v54, 0.0 }
 0x274   :  { %v2197_v60 = vadd.f32 %v2649_v55, %v4016_v48 }
 0x275   :  { %v2213_v2 = vsel %vm2211_vm3, %v4020_v58, 0.0 }
 0x276   :  { %v2214_v3 = vadd.f32 %v2213_v2, %v2212_v61 }
 0x277   :  { %v2170_v52 = vpop.f32.mrb[8].mxu1 }
 0x278   :  { %v2651_v4 = vadd.f32 %v2170_v52, %v1957_v35  ;;  %v2172_v8 = vpop.f32.mrb[9].mxu1 }
 0x279   :  { %v4027_v10 = vadd.f32 %v2172_v8, %v1959_v63  ;;  %v2174_v11 = vpop.f32.mrb[10].mxu1 }
 0x27a   :  { %v2198_v1 = vadd.f32 %v2651_v4, %v2197_v60  ;;  %v2653_v13 = vadd.f32 %v2174_v11, %v1961_v28  ;;  %v2176_v14 = vpop.f32.mrb[11].mxu1 }
 0x27b   :  { %v2215_v15 = vsel %vm2211_vm3, %v4027_v10, 0.0  ;;  %v2654_v16 = vadd.f32 %v2176_v14, %v1963_v33 }
 0x27c   :  { %v2216_v17 = vadd.f32 %v2215_v15, %v2214_v3  ;;  %v2199_v9 = vadd.f32 %v2653_v13, %v2198_v1 }
 0x27d   :  { %v2217_v7 = vsel %vm2211_vm3, %v2654_v16, 0.0 }
 0x27e   :  { %v2218_v18 = vadd.f32 %v2217_v7, %v2216_v17 }
 0x27f   :  { %v2180_v19 = vpop.f32.mrb[12].mxu1 }
 0x280   :  { %v2655_v56 = vadd.f32 %v2180_v19, %v1967_v29  ;;  %v2182_v20 = vpop.f32.mrb[13].mxu1 }
 0x281   :  { %v2656_v21 = vadd.f32 %v2182_v20, %v1969_v0  ;;  %v2184_v12 = vpop.f32.mrb[14].mxu1 }
 0x282   :  { %v2200_v22 = vadd.f32 %v2655_v56, %v2199_v9  ;;  %v2657_v5 = vadd.f32 %v2184_v12, %v1971_v59  ;;  %v2186_v23 = vpop.f32.mrb[15].mxu1 }
 0x283   :  { %v2219_v24 = vsel %vm2211_vm3, %v2656_v21, 0.0  ;;  %v2658_v26 = vadd.f32 %v2186_v23, %v1973_v42 }
 0x284   :  { %v2220_v27 = vadd.f32 %v2219_v24, %v2218_v18  ;;  %v2201_v31 = vadd.f32 %v2657_v5, %v2200_v22 }
 0x285   :  { %v2221_v30 = vsel %vm2211_vm3, %v2658_v26, 0.0 }
 0x286   :  { %v2222_v32 = vadd.f32 %v2221_v30, %v2220_v27 }
 0x287   :  { %v2190_v34 = vpop.f32.mrb[16].mxu1 }
 0x288   :  { %v2659_v6 = vadd.f32 %v2190_v34, %v1977_v43  ;;  %v2192_v36 = vpop.f32.mrb[17].mxu1 }
 0x289   :  { %v2660_v37 = vadd.f32 %v2192_v36, %v1979_v44  ;;  %v2194_v38 = vpop.f32.mrb[18].mxu1 }
 0x28a   :  { %v2203_v39 = vsel %vm2202_vm4, %v2659_v6, 0.0  ;;  %v2195_v40 = vpop.f32.mrb[19].mxu1 }
 0x28b   :  { %v2204_v41 = vadd.f32 %v2203_v39, %v2201_v31  ;;  %v2224_v62 = vsel %vm2223_vm5, %v2660_v37, 0.0 }
 0x28c   :  { %v2225_v35 = vadd.f32 %v2224_v62, %v2222_v32 }
 0x28d   :  { %v2205_v63 = vrot.slane %v2204_v41, 4 }
 0x28e   :  { %v2226_v28 = vrot.slane %v2225_v35, 4 }
 0x28f   :  { %v2206_v33 = vadd.f32 %v2205_v63, %v2204_v41 }
 0x290   :  { %v2227_v29 = vadd.f32 %v2226_v28, %v2225_v35 }
 0x291   :  { %v2207_v0 = vrot.slane %v2206_v33, 2 }
 0x292   :  { %v2228_v59 = vrot.slane %v2227_v29, 2 }
 0x293   :  { %v2208_v42 = vadd.f32 %v2207_v0, %v2206_v33 }
 0x294   :  { %v2229_v45 = vadd.f32 %v2228_v59, %v2227_v29 }
 0x295   :  { %v2209_v43 = vrot.slane %v2208_v42, 1 }
 0x296   :  { %v2230_v46 = vrot.slane %v2229_v45, 1 }
 0x297   :  { %v2210_v47 = vadd.f32 %v2209_v43, %v2208_v42 }
 0x298   :  { %v2231_v44 = vadd.f32 %v2230_v46, %v2229_v45 }
 0x299   :  { %v2233_v49 = vmul.f32 0.020408163, %v2210_v47 }
 0x29a   :  { %v2234_v25 = vmul.f32 0.020408163, %v2231_v44 }
 0x29b   :  { %v4037_v57 = vsub.f32 %v4016_v48, %v2233_v49  ;;  %v4039_v60 = vsub.f32 %v2649_v55, %v2233_v49  ;;  %v4041_v61 = vsub.f32 %v2651_v4, %v2233_v49  ;;  %v4043_v2 = vsub.f32 %v2653_v13, %v2233_v49 }
 0x29c   :  { %v4045_v3 = vsub.f32 %v2655_v56, %v2233_v49  ;;  %v4047_v52 = vsub.f32 %v2657_v5, %v2233_v49  ;;  %v4049_v8 = vsub.f32 %v2659_v6, %v2233_v49  ;;  %v4052_v11 = vsub.f32 %v4018_v54, %v2234_v25 }
 0x29d   :  { %v2249_v1 = vmul.f32 %v4037_v57, %v4037_v57  ;;  %v2251_v48 = vmul.f32 %v4039_v60, %v4039_v60  ;;  %v2253_v55 = vmul.f32 %v4041_v61, %v4041_v61  ;;  %v4061_v4 = vsub.f32 %v4020_v58, %v2234_v25 }
 0x29e   :  { %v4064_v14 = vsub.f32 %v4027_v10, %v2234_v25  ;;  %v4066_v15 = vsub.f32 %v2654_v16, %v2234_v25  ;;  %v4068_v54 = vsub.f32 %v2656_v21, %v2234_v25  ;;  %v4070_v17 = vsub.f32 %v2658_v26, %v2234_v25 }
 0x29f   :  { %v2263_v13 = vadd.f32 %v2251_v48, %v2249_v1  ;;  %v4072_v9 = vsub.f32 %v2660_v37, %v2234_v25  ;;  %v2250_v7 = vmul.f32 %v4052_v11, %v4052_v11  ;;  %v2255_v18 = vmul.f32 %v4043_v2, %v4043_v2 }
 0x2a0   :  { %v2252_v19 = vmul.f32 %v4061_v4, %v4061_v4  ;;  %v2254_v10 = vmul.f32 %v4064_v14, %v4064_v14  ;;  %v2257_v56 = vmul.f32 %v4045_v3, %v4045_v3  ;;  %v2256_v21 = vmul.f32 %v4066_v15, %v4066_v15 }
 0x2a1   :  { %v2264_v58 = vadd.f32 %v2263_v13, %v2253_v55  ;;  %v2276_v16 = vsel %vm2211_vm3, %v2250_v7, 0.0  ;;  %v2261_v22 = vmul.f32 %v4049_v8, %v4049_v8  ;;  %v2259_v23 = vmul.f32 %v4047_v52, %v4047_v52 }
 0x2a2   :  { %v2277_v12 = vsel %vm2211_vm3, %v2252_v19, 0.0  ;;  %v2258_v26 = vmul.f32 %v4068_v54, %v4068_v54  ;;  %v2279_v27 = vsel %vm2211_vm3, %v2254_v10, 0.0  ;;  %v2260_v32 = vmul.f32 %v4070_v17, %v4070_v17 }
 0x2a3   :  { %v2265_v20 = vadd.f32 %v2264_v58, %v2255_v18  ;;  %v2278_v5 = vadd.f32 %v2277_v12, %v2276_v16  ;;  %v2281_v34 = vsel %vm2211_vm3, %v2256_v21, 0.0  ;;  %v2268_v6 = vsel %vm2202_vm4, %v2261_v22, 0.0  ;;  %v2346_v12 = vld [vmem:[%s4161_s6] sm:$0x3] }
 0x2a4   :  { %v2262_v38 = vmul.f32 %v4072_v9, %v4072_v9  ;;  %v2283_v39 = vsel %vm2211_vm3, %v2258_v26, 0.0  ;;  %v2285_v62 = vsel %vm2211_vm3, %v2260_v32, 0.0  ;;  %v3092_v13 = vmov 1966171168  }
 0x2a5   :  { %v2266_v24 = vadd.f32 %v2265_v20, %v2257_v56  ;;  %v2280_v31 = vadd.f32 %v2279_v27, %v2278_v5  ;;  %v2306_v7 = vunpack.c.l.s4 %v3092_v13  ;;  %v2297_v20 = vld [vmem:[%s4160_s5] sm:$0x3]  ;;  %s3093_s5 = smov [#allocation2]  }
 0x2a6   :  { %v2287_v28 = vsel %vm2223_vm5, %v2262_v38, 0.0  ;;  %s2391_s6 = sshll.u32 %s3093_s5, 4  ;;  %s4130_s6 = int_to_ptr.vmem [resolvable:$true] %s2391_s6 }
 0x2a7   :  { %v2267_v30 = vadd.f32 %v2266_v24, %v2259_v23  ;;  %v2282_v36 = vadd.f32 %v2281_v34, %v2280_v31  ;;  %v2307_v18 = vunpack.c.0.s8 %v2306_v7  ;;  %v2351_v24 = vrot.slane %v2346_v12, %v3472_v51  ;;  %s3067_s8 = scalar_lea.vmem %s4130_s6, 1792  ;;  %p3072_p1 = scmp.lt.s32.totalorder %s4130_s6, %s4130_s6 }
 0x2a8   :  { %p3068_p0 = scmp.ne.s32.totalorder %s4130_s6, %s3067_s8  ;;  %p3073_p2 = scmp.lt.s32.totalorder %s3067_s8, %s3067_s8 }
 0x2a9   :  { %v2269_v37 = vadd.f32 %v2268_v6, %v2267_v30  ;;  %v2284_v40 = vadd.f32 %v2283_v39, %v2282_v36  ;;  %v2310_v19 = vsub.s32 %v2307_v18, %v3469_v50  ;;  %v2355_v50 = vrot.slane %v2346_v12, %v3480_v53 }
 0x2aa   :  { %p3074_p3 = por %p3073_p2, %p3072_p1 }
 0x2ab   :  { %v2270_v41 = vrot.slane %v2269_v37, 4  ;;  %v2286_v35 = vadd.f32 %v2285_v62, %v2284_v40 }
 0x2ac   :  { %p3075_p4 = pnand %p3074_p3, %p3068_p0 }
 0x2ad   :  { %v2271_v63 = vadd.f32 %v2270_v41, %v2269_v37  ;;  %v2288_v33 = vadd.f32 %v2287_v28, %v2286_v35 }
 0x2af   :  { %v2272_v29 = vrot.slane %v2271_v63, 2  ;;  %v2289_v0 = vrot.slane %v2288_v33, 4 }
 0x2b1   :  { %v2273_v59 = vadd.f32 %v2272_v29, %v2271_v63  ;;  %v2290_v42 = vadd.f32 %v2289_v0, %v2288_v33 }
 0x2b3   :  { %v2274_v45 = vrot.slane %v2273_v59, 1  ;;  %v2291_v43 = vrot.slane %v2290_v42, 2 }
 0x2b5   :  { %v2275_v46 = vadd.f32 %v2274_v45, %v2273_v59  ;;  %v2292_v47 = vadd.f32 %v2291_v43, %v2290_v42 }
 0x2b7   :  { %v2295_v44 = vmul.f32 0.020408163, %v2275_v46  ;;  %v2293_v49 = vrot.slane %v2292_v47, 1 }
 0x2b9   :  { %v2294_v25 = vadd.f32 %v2293_v49, %v2292_v47  ;;  %v2298_v1 = vadd.f32 1e-05, %v2295_v44 }
 0x2bb   :  { %v2296_v48 = vmul.f32 0.020408163, %v2294_v25  ;;  %3063 = vrsqrt.f32 %v2298_v1 }
 0x2bd   :  { %v2299_v55 = vadd.f32 1e-05, %v2296_v48 }
 0x2bf   :  { %3065 = vrsqrt.f32 %v2299_v55 }
 0x2c5   :  { %v3064_v58 = vpop.eup %3063 }
 0x2c9   :  { %v3066_v10 = vpop.eup %3065 }
 0x2ca   :  { %v2304_v16 = vcombine.low %v3064_v58, %v3066_v10 }
 0x2cc   :  { %v2311_v56 = vrot.slane %v2304_v16, %v2310_v19 }
 0x2ce   :  { %v2318_v21 = vrot.slane %v2311_v56, %v2310_v19 }
 0x2d0   :  { %v2320_v22 = vmul.f32 %v2318_v21, %v2297_v20 }
 0x2d2   :  { %v2325_v5 = vrot.slane %v2320_v22, %v3472_v51  ;;  %v2329_v23 = vrot.slane %v2320_v22, %v3480_v53 }
 0x2d4   :  { %v2332_v26 = vmul.f32 %v2325_v5, %v4037_v57  ;;  %v2333_v27 = vmul.f32 %v2329_v23, %v4052_v11  ;;  %v2334_v31 = vmul.f32 %v2325_v5, %v4039_v60  ;;  %v2335_v30 = vmul.f32 %v2329_v23, %v4061_v4 }
 0x2d5   :  { %v2336_v32 = vmul.f32 %v2325_v5, %v4041_v61  ;;  %v2337_v34 = vmul.f32 %v2329_v23, %v4064_v14  ;;  %v2338_v6 = vmul.f32 %v2325_v5, %v4043_v2  ;;  %v2339_v36 = vmul.f32 %v2329_v23, %v4066_v15 }
 0x2d6   :  { %v2340_v51 = vmul.f32 %v2325_v5, %v4045_v3  ;;  %v2341_v53 = vmul.f32 %v2329_v23, %v4068_v54  ;;  %v2342_v57 = vmul.f32 %v2325_v5, %v4047_v52  ;;  %v2343_v11 = vmul.f32 %v2329_v23, %v4070_v17 }
 0x2d7   :  { %v2344_v60 = vmul.f32 %v2325_v5, %v4049_v8  ;;  %v2345_v61 = vmul.f32 %v2329_v23, %v4072_v9  ;;  %v2358_v4 = vadd.f32 %v2351_v24, %v2332_v26  ;;  %v2359_v14 = vadd.f32 %v2355_v50, %v2333_v27 }
 0x2d8   :  { %v2360_v37 = vadd.f32 %v2351_v24, %v2334_v31  ;;  %v2361_v2 = vadd.f32 %v2355_v50, %v2335_v30  ;;  %v2362_v38 = vadd.f32 %v2351_v24, %v2336_v32  ;;  %v2363_v15 = vadd.f32 %v2355_v50, %v2337_v34 }
 0x2d9   :  { %v2364_v39 = vadd.f32 %v2351_v24, %v2338_v6  ;;  %v2365_v3 = vadd.f32 %v2355_v50, %v2339_v36  ;;  %v2366_v40 = vadd.f32 %v2351_v24, %v2340_v51  ;;  %v2367_v54 = vadd.f32 %v2355_v50, %v2341_v53  ;;  %2372 = vst [vmem:[#allocation2] sm:$0xff] %v2358_v4 }
 0x2da   :  { %2373 = vst.msk [vmem:[#allocation2 + $0x8] sm:$0xff] %vm2211_vm3, %v2359_v14  ;;  %v2368_v52 = vadd.f32 %v2351_v24, %v2342_v57  ;;  %v2369_v8 = vadd.f32 %v2355_v50, %v2343_v11  ;;  %v2370_v17 = vadd.f32 %v2351_v24, %v2344_v60  ;;  %v2371_v9 = vadd.f32 %v2355_v50, %v2345_v61 }
 0x2db   :  { %2374 = vst [vmem:[#allocation2 + $0x10] sm:$0xff] %v2360_v37  ;;  %2375 = vst.msk [vmem:[#allocation2 + $0x18] sm:$0xff] %vm2211_vm3, %v2361_v2 }
 0x2dc   :  { %2376 = vst [vmem:[#allocation2 + $0x20] sm:$0xff] %v2362_v38  ;;  %2377 = vst.msk [vmem:[#allocation2 + $0x28] sm:$0xff] %vm2211_vm3, %v2363_v15 }
 0x2dd   :  { %2378 = vst [vmem:[#allocation2 + $0x30] sm:$0xff] %v2364_v39  ;;  %2379 = vst.msk [vmem:[#allocation2 + $0x38] sm:$0xff] %vm2211_vm3, %v2365_v3 }
 0x2de   :  { %2380 = vst [vmem:[#allocation2 + $0x40] sm:$0xff] %v2366_v40  ;;  %2381 = vst.msk [vmem:[#allocation2 + $0x48] sm:$0xff] %vm2211_vm3, %v2367_v54 }
 0x2df   :  { %2382 = vst [vmem:[#allocation2 + $0x50] sm:$0xff] %v2368_v52  ;;  %2383 = vst.msk [vmem:[#allocation2 + $0x58] sm:$0xff] %vm2211_vm3, %v2369_v8 }
 0x2e0   :  { %2384 = vst [vmem:[#allocation2 + $0x60] sm:$0x1] %v2370_v17  ;;  %2385 = vst.msk [vmem:[#allocation2 + $0x68] sm:$0x1] %vm2223_vm5, %v2371_v9 }
 0x2e1   :  { %3078 = shalt.err (!%p3075_p4)
}
 0x2e2   :  { %s3079_s11 = scalar_lea.hbm %s4162_s7, 1792 }
 0x2e3   :  { %p3080_p5 = scmp.ne.s32.totalorder %s4162_s7, %s3079_s11  ;;  %p3083_p6 = scmp.lt.u32.totalorder %s3079_s11, %s4162_s7 }
 0x2e5   :  { %p3085_p7 = pnand %p3083_p6, %p3080_p5 }
 0x2e7   :  { %3088 = shalt.err (!%p3085_p7)
}
 0x2e8   :  { %s3094_s16 = smov 256   ;;  %s3095_s17 = smov 16  }
 0x2e9   :  { %2397 = dma.vmem_to_hbm [thread:$0]  %s4130_s6, 1792, %s4162_s7, [#allocation3], %s3094_s16, %s3094_s16, %s3095_s17  }
 0x2ea   :  { %3089 = dma.done.wait [#allocation3], 1792  }
 0x2eb   :  { %3090 = vsyncadd [#allocation3], 4294965504 }
 0x2ec   :  { %2401 = vsyncpa [#allocation3], 1 }

</bundles_post_ra>
